<compile_context>
chip_gen: v6e
topology: v6e:2x2x1
jax: 0.10.0
libtpu: 0.0.40
codegen_flags: <defaults>
</compile_context>

<pallas_src>
import jax
import jax.numpy as jnp
from jax.experimental import pallas as pl
from jax.experimental.pallas import tpu as pltpu

NOISE_DIM = 100
NUM_CLASSES = 10
INPUT_DIM = NOISE_DIM + NUM_CLASSES          # 110
IN_PAD = 128                                 # lane-dense input width
IMG_SHAPE = (1, 28, 28)
IMG_FLAT = 1 * 28 * 28                       # 784
OUT_PAD = 896                                # 7 * 128, lane-dense output width
EPS = 1e-5
MAX_BATCH = 1024                             # full-batch-in-VMEM BN limit


def _generator_kernel(
    x_ref,                     # (B, 128)  f32  lane-padded concat(noise, emb)
    w1_ref, b1_ref,            # (128, 128) bf16, (1, 128) f32
    w2_ref, b2_ref,            # (128, 256) bf16, (1, 256) f32
    g2_ref, be2_ref,           # (1, 256) f32, (1, 256) f32   BN2 gamma/beta
    w3_ref, b3_ref,            # (256, 512) bf16, (1, 512) f32
    g3_ref, be3_ref,           # (1, 512) f32, (1, 512) f32   BN3 gamma/beta
    w4_ref, b4_ref,            # (512, 896) bf16, (1, 896) f32 (zero-padded)
    out_ref,                   # (B, 896)  f32
):
    # --- Linear 1 + ReLU (bf16 operands, f32 MXU accumulation) ---
    x = x_ref[...].astype(jnp.bfloat16)
    h1 = jnp.dot(x, w1_ref[...], preferred_element_type=jnp.float32) + b1_ref[...]
    h1 = jnp.maximum(h1, 0.0)

    # --- Linear 2 + BatchNorm1d (batch stats, biased var) + ReLU ---
    h2 = jnp.dot(h1.astype(jnp.bfloat16), w2_ref[...],
                 preferred_element_type=jnp.float32) + b2_ref[...]
    mu2 = jnp.mean(h2, axis=0, keepdims=True)
    var2 = jnp.mean(h2 * h2, axis=0, keepdims=True) - mu2 * mu2
    s2 = g2_ref[...] * jax.lax.rsqrt(var2 + EPS)
    t2 = be2_ref[...] - mu2 * s2
    h2 = jnp.maximum(h2 * s2 + t2, 0.0)

    # --- Linear 3 + BatchNorm1d + ReLU ---
    h3 = jnp.dot(h2.astype(jnp.bfloat16), w3_ref[...],
                 preferred_element_type=jnp.float32) + b3_ref[...]
    mu3 = jnp.mean(h3, axis=0, keepdims=True)
    var3 = jnp.mean(h3 * h3, axis=0, keepdims=True) - mu3 * mu3
    s3 = g3_ref[...] * jax.lax.rsqrt(var3 + EPS)
    t3 = be3_ref[...] - mu3 * s3
    h3 = jnp.maximum(h3 * s3 + t3, 0.0)

    # --- Linear 4 + Tanh (padded cols of w4/b4 are zero -> tanh(0) = 0) ---
    h4 = jnp.dot(h3.astype(jnp.bfloat16), w4_ref[...],
                 preferred_element_type=jnp.float32) + b4_ref[...]
    out_ref[...] = jnp.tanh(h4)


def init_params(key):
    """Kernel-ready params: lane-padded, weights in bf16, everything else f32."""
    ks = jax.random.split(key, 10)
    p = {}
    p["emb"] = jax.random.normal(ks[0], (NUM_CLASSES, NUM_CLASSES), jnp.float32)

    w1 = jax.random.normal(ks[1], (INPUT_DIM, 128), jnp.float32) * 0.05
    p["w1"] = jnp.pad(w1, ((0, IN_PAD - INPUT_DIM), (0, 0))).astype(jnp.bfloat16)
    p["b1"] = jax.random.normal(ks[2], (1, 128), jnp.float32) * 0.01

    p["w2"] = (jax.random.normal(ks[3], (128, 256), jnp.float32) * 0.05).astype(jnp.bfloat16)
    p["b2"] = jax.random.normal(ks[4], (1, 256), jnp.float32) * 0.01
    p["g2"] = jnp.ones((1, 256), jnp.float32)
    p["be2"] = jnp.zeros((1, 256), jnp.float32)

    p["w3"] = (jax.random.normal(ks[5], (256, 512), jnp.float32) * 0.05).astype(jnp.bfloat16)
    p["b3"] = jax.random.normal(ks[6], (1, 512), jnp.float32) * 0.01
    p["g3"] = jnp.ones((1, 512), jnp.float32)
    p["be3"] = jnp.zeros((1, 512), jnp.float32)

    w4 = jax.random.normal(ks[7], (512, IMG_FLAT), jnp.float32) * 0.05
    b4 = jax.random.normal(ks[8], (1, IMG_FLAT), jnp.float32) * 0.01
    p["w4"] = jnp.pad(w4, ((0, 0), (0, OUT_PAD - IMG_FLAT))).astype(jnp.bfloat16)
    p["b4"] = jnp.pad(b4, ((0, 0), (0, OUT_PAD - IMG_FLAT)))
    return p


def _build_padded_input(noise, labels, emb):
    """Embedding lookup + concat + zero-pad to a lane-dense (B, 128) slab."""
    B = noise.shape[0]
    label_emb = jnp.take(emb, labels, axis=0)                       # (B, 10)
    pad = jnp.zeros((B, IN_PAD - INPUT_DIM), jnp.float32)           # (B, 18)
    return jnp.concatenate([noise, label_emb, pad], axis=1)         # (B, 128)


def generator_forward(noise, labels, params):
    """noise: (B, 100) f32, labels: (B,) int32 -> img: (B, 1, 28, 28) f32."""
    B = noise.shape[0]
    assert B <= MAX_BATCH, "full-batch BN tile; see TODO(synk) for larger B"

    x = _build_padded_input(noise, labels, params["emb"])           # (B, 128)

    vmem = pltpu.MemorySpace.VMEM
    kernel_args = (
        x,
        params["w1"], params["b1"],
        params["w2"], params["b2"], params["g2"], params["be2"],
        params["w3"], params["b3"], params["g3"], params["be3"],
        params["w4"], params["b4"],
    )
    flat = pl.pallas_call(
        _generator_kernel,
        out_shape=jax.ShapeDtypeStruct((B, OUT_PAD), jnp.float32),
        in_specs=[pl.BlockSpec(memory_space=vmem)] * len(kernel_args),
        out_specs=pl.BlockSpec(memory_space=vmem),
    )(*kernel_args)

    return flat[:, :IMG_FLAT].reshape(B, *IMG_SHAPE)


def _reference_forward(noise, labels, params):
    """Pure-JAX reference mirroring the kernel numerics (bf16 matmul operands,
    f32 accumulation, folded BN).  bf16 weights shift low-order bits vs. a
    full-f32 forward, as noted in the perf review."""
    B = noise.shape[0]
    x = _build_padded_input(noise, labels, params["emb"]).astype(jnp.bfloat16)

    h = jnp.dot(x, params["w1"], preferred_element_type=jnp.float32) + params["b1"]
    h = jnp.maximum(h, 0.0)

    def lin_bn_relu(h, w, b, g, be):
        h = jnp.dot(h.astype(jnp.bfloat16), w,
                    preferred_element_type=jnp.float32) + b
        mu = jnp.mean(h, axis=0, keepdims=True)
        var = jnp.mean(h * h, axis=0, keepdims=True) - mu * mu
        s = g * jax.lax.rsqrt(var + EPS)
        return jnp.maximum(h * s + (be - mu * s), 0.0)

    h = lin_bn_relu(h, params["w2"], params["b2"], params["g2"], params["be2"])
    h = lin_bn_relu(h, params["w3"], params["b3"], params["g3"], params["be3"])
    h = jnp.tanh(jnp.dot(h.astype(jnp.bfloat16), params["w4"],
                         preferred_element_type=jnp.float32) + params["b4"])
    return h[:, :IMG_FLAT].reshape(B, *IMG_SHAPE)


if __name__ == "__main__":
    key = jax.random.PRNGKey(0)
    k_param, k_noise, k_label = jax.random.split(key, 3)

    B = 8
    params = init_params(k_param)
    noise = jax.random.normal(k_noise, (B, NOISE_DIM), jnp.float32)
    labels = jax.random.randint(k_label, (B,), 0, NUM_CLASSES, jnp.int32)

    img = generator_forward(noise, labels, params)
    img = jax.block_until_ready(img)
    assert img.shape == (B, 1, 28, 28), img.shape

    ref = jax.block_until_ready(_reference_forward(noise, labels, params))
    assert jnp.allclose(img, ref, atol=2e-3, rtol=2e-3), (
        float(jnp.max(jnp.abs(img - ref))))

    print("KERNEL_OK")
</pallas_src>

<mosaic_0001>
module attributes {stable_mosaic.version = 11 : i64} {
  func.func @_generator_kernel(%arg0: memref<8x128xf32, #tpu.memory_space<vmem>>, %arg1: memref<128x128xbf16, #tpu.memory_space<vmem>>, %arg2: memref<1x128xf32, #tpu.memory_space<vmem>>, %arg3: memref<128x256xbf16, #tpu.memory_space<vmem>>, %arg4: memref<1x256xf32, #tpu.memory_space<vmem>>, %arg5: memref<1x256xf32, #tpu.memory_space<vmem>>, %arg6: memref<1x256xf32, #tpu.memory_space<vmem>>, %arg7: memref<256x512xbf16, #tpu.memory_space<vmem>>, %arg8: memref<1x512xf32, #tpu.memory_space<vmem>>, %arg9: memref<1x512xf32, #tpu.memory_space<vmem>>, %arg10: memref<1x512xf32, #tpu.memory_space<vmem>>, %arg11: memref<512x896xbf16, #tpu.memory_space<vmem>>, %arg12: memref<1x896xf32, #tpu.memory_space<vmem>>, %arg13: memref<8x896xf32, #tpu.memory_space<vmem>>) attributes {dimension_semantics = [], scalar_prefetch = 0 : i64, scratch_operands = 0 : i64, tpu.core_type = #tpu.core_type<tc>} {
    %c0 = arith.constant 0 : index
    %c0_0 = arith.constant 0 : index
    %0 = vector.load %arg0[%c0, %c0_0] : memref<8x128xf32, #tpu.memory_space<vmem>>, vector<8x128xf32>
    %1 = arith.truncf %0 : vector<8x128xf32> to vector<8x128xbf16>
    %c0_1 = arith.constant 0 : index
    %c0_2 = arith.constant 0 : index
    %2 = vector.load %arg1[%c0_1, %c0_2] : memref<128x128xbf16, #tpu.memory_space<vmem>>, vector<128x128xbf16>
    %cst = arith.constant dense<0.000000e+00> : vector<8x128xf32>
    %3 = tpu.matmul %1, %2, %cst {dimension_numbers = #tpu.dot_dimension_numbers<[1], [0], [0], [1], [0, 0, 1, 1], [], []>} : vector<8x128xbf16>, vector<128x128xbf16>, vector<8x128xf32> -> vector<8x128xf32>
    %c0_3 = arith.constant 0 : index
    %c0_4 = arith.constant 0 : index
    %4 = vector.load %arg2[%c0_3, %c0_4] : memref<1x128xf32, #tpu.memory_space<vmem>>, vector<1x128xf32>
    %5 = vector.broadcast %4 : vector<1x128xf32> to vector<8x128xf32>
    %6 = arith.addf %3, %5 : vector<8x128xf32>
    %cst_5 = arith.constant 0.000000e+00 : f32
    %7 = vector.broadcast %cst_5 : f32 to vector<8x128xf32>
    %8 = arith.maximumf %6, %7 : vector<8x128xf32>
    %9 = arith.truncf %8 : vector<8x128xf32> to vector<8x128xbf16>
    %c0_6 = arith.constant 0 : index
    %c0_7 = arith.constant 0 : index
    %10 = vector.load %arg3[%c0_6, %c0_7] : memref<128x256xbf16, #tpu.memory_space<vmem>>, vector<128x256xbf16>
    %cst_8 = arith.constant dense<0.000000e+00> : vector<8x256xf32>
    %11 = tpu.matmul %9, %10, %cst_8 {dimension_numbers = #tpu.dot_dimension_numbers<[1], [0], [0], [1], [0, 0, 1, 1], [], []>} : vector<8x128xbf16>, vector<128x256xbf16>, vector<8x256xf32> -> vector<8x256xf32>
    %c0_9 = arith.constant 0 : index
    %c0_10 = arith.constant 0 : index
    %12 = vector.load %arg4[%c0_9, %c0_10] : memref<1x256xf32, #tpu.memory_space<vmem>>, vector<1x256xf32>
    %13 = vector.broadcast %12 : vector<1x256xf32> to vector<8x256xf32>
    %14 = arith.addf %11, %13 : vector<8x256xf32>
    %cst_11 = arith.constant dense<0.000000e+00> : vector<256xf32>
    %15 = vector.multi_reduction <add>, %14, %cst_11 [0] : vector<8x256xf32> to vector<256xf32>
    %16 = vector.shape_cast %15 : vector<256xf32> to vector<1x256xf32>
    %cst_12 = arith.constant 8.000000e+00 : f32
    %17 = vector.broadcast %cst_12 : f32 to vector<1x256xf32>
    %18 = arith.divf %16, %17 : vector<1x256xf32>
    %19 = arith.mulf %14, %14 : vector<8x256xf32>
    %cst_13 = arith.constant dense<0.000000e+00> : vector<256xf32>
    %20 = vector.multi_reduction <add>, %19, %cst_13 [0] : vector<8x256xf32> to vector<256xf32>
    %21 = vector.shape_cast %20 : vector<256xf32> to vector<1x256xf32>
    %cst_14 = arith.constant 8.000000e+00 : f32
    %22 = vector.broadcast %cst_14 : f32 to vector<1x256xf32>
    %23 = arith.divf %21, %22 : vector<1x256xf32>
    %24 = arith.mulf %18, %18 : vector<1x256xf32>
    %25 = arith.subf %23, %24 : vector<1x256xf32>
    %c0_15 = arith.constant 0 : index
    %c0_16 = arith.constant 0 : index
    %26 = vector.load %arg5[%c0_15, %c0_16] : memref<1x256xf32, #tpu.memory_space<vmem>>, vector<1x256xf32>
    %cst_17 = arith.constant 9.99999974E-6 : f32
    %27 = vector.broadcast %cst_17 : f32 to vector<1x256xf32>
    %28 = arith.addf %25, %27 : vector<1x256xf32>
    %29 = math.rsqrt %28 : vector<1x256xf32>
    %30 = arith.mulf %26, %29 : vector<1x256xf32>
    %c0_18 = arith.constant 0 : index
    %c0_19 = arith.constant 0 : index
    %31 = vector.load %arg6[%c0_18, %c0_19] : memref<1x256xf32, #tpu.memory_space<vmem>>, vector<1x256xf32>
    %32 = arith.mulf %18, %30 : vector<1x256xf32>
    %33 = arith.subf %31, %32 : vector<1x256xf32>
    %34 = vector.broadcast %30 : vector<1x256xf32> to vector<8x256xf32>
    %35 = arith.mulf %14, %34 : vector<8x256xf32>
    %36 = vector.broadcast %33 : vector<1x256xf32> to vector<8x256xf32>
    %37 = arith.addf %35, %36 : vector<8x256xf32>
    %cst_20 = arith.constant 0.000000e+00 : f32
    %38 = vector.broadcast %cst_20 : f32 to vector<8x256xf32>
    %39 = arith.maximumf %37, %38 : vector<8x256xf32>
    %40 = arith.truncf %39 : vector<8x256xf32> to vector<8x256xbf16>
    %c0_21 = arith.constant 0 : index
    %c0_22 = arith.constant 0 : index
    %41 = vector.load %arg7[%c0_21, %c0_22] : memref<256x512xbf16, #tpu.memory_space<vmem>>, vector<256x512xbf16>
    %cst_23 = arith.constant dense<0.000000e+00> : vector<8x512xf32>
    %42 = tpu.matmul %40, %41, %cst_23 {dimension_numbers = #tpu.dot_dimension_numbers<[1], [0], [0], [1], [0, 0, 1, 1], [], []>} : vector<8x256xbf16>, vector<256x512xbf16>, vector<8x512xf32> -> vector<8x512xf32>
    %c0_24 = arith.constant 0 : index
    %c0_25 = arith.constant 0 : index
    %43 = vector.load %arg8[%c0_24, %c0_25] : memref<1x512xf32, #tpu.memory_space<vmem>>, vector<1x512xf32>
    %44 = vector.broadcast %43 : vector<1x512xf32> to vector<8x512xf32>
    %45 = arith.addf %42, %44 : vector<8x512xf32>
    %cst_26 = arith.constant dense<0.000000e+00> : vector<512xf32>
    %46 = vector.multi_reduction <add>, %45, %cst_26 [0] : vector<8x512xf32> to vector<512xf32>
    %47 = vector.shape_cast %46 : vector<512xf32> to vector<1x512xf32>
    %cst_27 = arith.constant 8.000000e+00 : f32
    %48 = vector.broadcast %cst_27 : f32 to vector<1x512xf32>
    %49 = arith.divf %47, %48 : vector<1x512xf32>
    %50 = arith.mulf %45, %45 : vector<8x512xf32>
    %cst_28 = arith.constant dense<0.000000e+00> : vector<512xf32>
    %51 = vector.multi_reduction <add>, %50, %cst_28 [0] : vector<8x512xf32> to vector<512xf32>
    %52 = vector.shape_cast %51 : vector<512xf32> to vector<1x512xf32>
    %cst_29 = arith.constant 8.000000e+00 : f32
    %53 = vector.broadcast %cst_29 : f32 to vector<1x512xf32>
    %54 = arith.divf %52, %53 : vector<1x512xf32>
    %55 = arith.mulf %49, %49 : vector<1x512xf32>
    %56 = arith.subf %54, %55 : vector<1x512xf32>
    %c0_30 = arith.constant 0 : index
    %c0_31 = arith.constant 0 : index
    %57 = vector.load %arg9[%c0_30, %c0_31] : memref<1x512xf32, #tpu.memory_space<vmem>>, vector<1x512xf32>
    %cst_32 = arith.constant 9.99999974E-6 : f32
    %58 = vector.broadcast %cst_32 : f32 to vector<1x512xf32>
    %59 = arith.addf %56, %58 : vector<1x512xf32>
    %60 = math.rsqrt %59 : vector<1x512xf32>
    %61 = arith.mulf %57, %60 : vector<1x512xf32>
    %c0_33 = arith.constant 0 : index
    %c0_34 = arith.constant 0 : index
    %62 = vector.load %arg10[%c0_33, %c0_34] : memref<1x512xf32, #tpu.memory_space<vmem>>, vector<1x512xf32>
    %63 = arith.mulf %49, %61 : vector<1x512xf32>
    %64 = arith.subf %62, %63 : vector<1x512xf32>
    %65 = vector.broadcast %61 : vector<1x512xf32> to vector<8x512xf32>
    %66 = arith.mulf %45, %65 : vector<8x512xf32>
    %67 = vector.broadcast %64 : vector<1x512xf32> to vector<8x512xf32>
    %68 = arith.addf %66, %67 : vector<8x512xf32>
    %cst_35 = arith.constant 0.000000e+00 : f32
    %69 = vector.broadcast %cst_35 : f32 to vector<8x512xf32>
    %70 = arith.maximumf %68, %69 : vector<8x512xf32>
    %71 = arith.truncf %70 : vector<8x512xf32> to vector<8x512xbf16>
    %c0_36 = arith.constant 0 : index
    %c0_37 = arith.constant 0 : index
    %72 = vector.load %arg11[%c0_36, %c0_37] : memref<512x896xbf16, #tpu.memory_space<vmem>>, vector<512x896xbf16>
    %cst_38 = arith.constant dense<0.000000e+00> : vector<8x896xf32>
    %73 = tpu.matmul %71, %72, %cst_38 {dimension_numbers = #tpu.dot_dimension_numbers<[1], [0], [0], [1], [0, 0, 1, 1], [], []>} : vector<8x512xbf16>, vector<512x896xbf16>, vector<8x896xf32> -> vector<8x896xf32>
    %c0_39 = arith.constant 0 : index
    %c0_40 = arith.constant 0 : index
    %74 = vector.load %arg12[%c0_39, %c0_40] : memref<1x896xf32, #tpu.memory_space<vmem>>, vector<1x896xf32>
    %75 = vector.broadcast %74 : vector<1x896xf32> to vector<8x896xf32>
    %76 = arith.addf %73, %75 : vector<8x896xf32>
    %77 = math.tanh %76 : vector<8x896xf32>
    %c0_41 = arith.constant 0 : index
    %c0_42 = arith.constant 0 : index
    %78 = vector.load %arg13[%c0_41, %c0_42] : memref<8x896xf32, #tpu.memory_space<vmem>>, vector<8x896xf32>
    tpu.vector_store %arg13[%c0_41, %c0_42], %77 {strides = array<i32>} : memref<8x896xf32, #tpu.memory_space<vmem>>, vector<8x896xf32>,
    return
  }
}

</mosaic_0001>

<bundles_post_ra>
// kernel: tpu_custom_call.1
= control target key start
LH: loop header
LB: loop body
LE: loop exit
PB: predicated region body
PF: predicated region fallthrough
CT: control target
= control target key end

     0   :  { %18 = vsyncpa [#allocation3], 0  ;;  %s4373_s0 = inlined_call_operand.hbm [shape: f32[8,128], index: 0, kind: input, shape index: {}]   ;;  %s4374_s1 = inlined_call_operand.hbm [shape: bf16[128,128], index: 1, kind: input, shape index: {}]   ;;  %s4375_s2 = inlined_call_operand.vmem [shape: f32[1,128], index: 2, kind: input, shape index: {}]   ;;  %s4376_s3 = inlined_call_operand.hbm [shape: bf16[128,256], index: 3, kind: input, shape index: {}]   ;;  %s4377_s4 = inlined_call_operand.hbm [shape: f32[1,256], index: 4, kind: input, shape index: {}]   ;;  %s4378_s5 = inlined_call_operand.hbm [shape: f32[1,256], index: 5, kind: input, shape index: {}]   ;;  %s4379_s6 = inlined_call_operand.hbm [shape: f32[1,256], index: 6, kind: input, shape index: {}]   ;;  %s4380_s7 = inlined_call_operand.hbm [shape: bf16[256,512], index: 7, kind: input, shape index: {}]   ;;  %s4381_s8 = inlined_call_operand.vmem [shape: f32[1,512], index: 8, kind: input, shape index: {}]   ;;  %s4382_s9 = inlined_call_operand.vmem [shape: f32[1,512], index: 9, kind: input, shape index: {}]   ;;  %s4383_s10 = inlined_call_operand.hbm [shape: f32[1,512], index: 10, kind: input, shape index: {}]   ;;  %s4384_s11 = inlined_call_operand.hbm [shape: bf16[512,896], index: 11, kind: input, shape index: {}]   ;;  %s4385_s12 = inlined_call_operand.vmem [shape: f32[1,896], index: 12, kind: input, shape index: {}]   ;;  %s4386_s13 = inlined_call_operand.hbm [shape: f32[8,896], index: 13, kind: output, shape index: {}]  }
   0x1   :  { %19 = vsyncpa [#allocation6], 0 }
   0x2   :  { %20 = vsyncpa [#allocation9], 0 }
   0x3   :  { %21 = vsyncpa [#allocation12], 0 }
   0x4   :  { %22 = vsyncpa [#allocation15], 0 }
   0x5   :  { %23 = vsyncpa [#allocation4], 0  ;;  %s4119_s25 = smov [#allocation5]  }
   0x6   :  { %s39_s26 = sshll.u32 %s4119_s25, 4  ;;  %s40_s26 = int_to_ptr.vmem [resolvable:$true] %s39_s26 }
   0x7   :  { %s3915_s27 = scalar_lea.vmem %s40_s26, 1024  ;;  %p3920_p1 = scmp.lt.s32.totalorder %s40_s26, %s40_s26 }
   0x8   :  { %p3916_p0 = scmp.ne.s32.totalorder %s40_s26, %s3915_s27  ;;  %p3921_p2 = scmp.lt.s32.totalorder %s3915_s27, %s3915_s27 }
   0xa   :  { %p3922_p3 = por %p3921_p2, %p3920_p1 }
   0xc   :  { %p3923_p4 = pnand %p3922_p3, %p3916_p0 }
   0xe   :  { %3926 = shalt.err (!%p3923_p4)
}
   0xf   :  { %s4120_s28 = smov 64   ;;  %s4121_s29 = smov 4  }
  0x10   :  { %45 = dma.hbm_to_vmem [thread:$0]  %s4374_s1, 1024, %s40_s26, [#allocation6], %s4120_s28, %s4120_s28, %s4121_s29  }
  0x11   :  { %s4122_s15 = smov [#allocation8]   ;;  %s4123_s17 = smov [#allocation11]  }
  0x12   :  { %s66_s16 = sshll.u32 %s4122_s15, 4  ;;  %s86_s18 = sshll.u32 %s4123_s17, 4  ;;  %s67_s16 = int_to_ptr.vmem [resolvable:$true] %s66_s16  ;;  %s87_s18 = int_to_ptr.vmem [resolvable:$true] %s86_s18 }
  0x13   :  { %s3935_s19 = scalar_lea.vmem %s67_s16, 32  ;;  %p3940_p6 = scmp.lt.s32.totalorder %s67_s16, %s67_s16 }
  0x14   :  { %p3936_p5 = scmp.ne.s32.totalorder %s67_s16, %s3935_s19  ;;  %p3941_p7 = scmp.lt.s32.totalorder %s3935_s19, %s3935_s19 }
  0x16   :  { %p3942_p8 = por %p3941_p7, %p3940_p6 }
  0x18   :  { %p3943_p9 = pnand %p3942_p8, %p3936_p5 }
  0x1a   :  { %3946 = shalt.err (!%p3943_p9)
}
  0x1b   :  { %69 = dma.hbm_to_vmem [thread:$0]  %s4377_s4, 32, %s67_s16, [#allocation9]  }
  0x1c   :  { %s3955_s22 = scalar_lea.vmem %s87_s18, 32  ;;  %p3960_p11 = scmp.lt.s32.totalorder %s87_s18, %s87_s18 }
  0x1d   :  { %p3956_p10 = scmp.ne.s32.totalorder %s87_s18, %s3955_s22  ;;  %p3961_p12 = scmp.lt.s32.totalorder %s3955_s22, %s3955_s22 }
  0x1f   :  { %p3962_p13 = por %p3961_p12, %p3960_p11 }
  0x21   :  { %p3963_p0 = pnand %p3962_p13, %p3956_p10 }
  0x23   :  { %3966 = shalt.err (!%p3963_p0)
}
  0x24   :  { %89 = dma.hbm_to_vmem [thread:$0]  %s4379_s6, 32, %s87_s18, [#allocation12]  }
  0x25   :  { %s4124_s24 = smov [#allocation14]   ;;  %s4125_s26 = smov [#allocation2]  }
  0x26   :  { %s112_s25 = sshll.u32 %s4124_s24, 4  ;;  %s30_s27 = sshll.u32 %s4125_s26, 4  ;;  %s113_s25 = int_to_ptr.vmem [resolvable:$true] %s112_s25  ;;  %s31_s27 = int_to_ptr.vmem [resolvable:$true] %s30_s27 }
  0x27   :  { %s3975_s28 = scalar_lea.vmem %s113_s25, 64  ;;  %p3980_p2 = scmp.lt.s32.totalorder %s113_s25, %s113_s25 }
  0x28   :  { %p3976_p1 = scmp.ne.s32.totalorder %s113_s25, %s3975_s28  ;;  %p3981_p3 = scmp.lt.s32.totalorder %s3975_s28, %s3975_s28 }
  0x2a   :  { %p3982_p4 = por %p3981_p3, %p3980_p2 }
  0x2c   :  { %p3983_p5 = pnand %p3982_p4, %p3976_p1 }
  0x2e   :  { %3986 = shalt.err (!%p3983_p5)
}
  0x2f   :  { %115 = dma.hbm_to_vmem [thread:$0]  %s4383_s10, 64, %s113_s25, [#allocation15]  }
  0x30   :  { %s3995_s30 = scalar_lea.vmem %s31_s27, 128  ;;  %p4000_p7 = scmp.lt.s32.totalorder %s31_s27, %s31_s27 }
  0x31   :  { %p3996_p6 = scmp.ne.s32.totalorder %s31_s27, %s3995_s30  ;;  %p4001_p8 = scmp.lt.s32.totalorder %s3995_s30, %s3995_s30 }
  0x33   :  { %p4002_p9 = por %p4001_p8, %p4000_p7 }
  0x35   :  { %p4003_p10 = pnand %p4002_p9, %p3996_p6 }
  0x37   :  { %4006 = shalt.err (!%p4003_p10)
}
  0x38   :  { %33 = dma.hbm_to_vmem [thread:$0]  %s4373_s0, 128, %s31_s27, [#allocation3]  }
  0x39   :  { %s4126_s15 = smov [#allocation7]  }
  0x3a   :  { %s53_s16 = sshll.u32 %s4126_s15, 4  ;;  %s54_s16 = int_to_ptr.vmem [resolvable:$true] %s53_s16 }
  0x3b   :  { %s4015_s17 = scalar_lea.vmem %s54_s16, 2048  ;;  %p4020_p12 = scmp.lt.s32.totalorder %s54_s16, %s54_s16 }
  0x3c   :  { %p4016_p11 = scmp.ne.s32.totalorder %s54_s16, %s4015_s17  ;;  %p4021_p13 = scmp.lt.s32.totalorder %s4015_s17, %s4015_s17 }
  0x3e   :  { %p4022_p0 = por %p4021_p13, %p4020_p12 }
  0x40   :  { %p4023_p1 = pnand %p4022_p0, %p4016_p11 }
  0x42   :  { %4026 = shalt.err (!%p4023_p1)
}
  0x43   :  { %s4127_s10 = smov 128   ;;  %s4128_s18 = smov 8  }
  0x44   :  { %59 = dma.hbm_to_vmem [thread:$0]  %s4376_s3, 2048, %s54_s16, [#allocation6], %s4127_s10, %s4127_s10, %s4128_s18  }
  0x45   :  { %s4129_s21 = smov [#allocation10]   ;;  %s4130_s1 = smov [#allocation13]  }
  0x46   :  { %s76_s22 = sshll.u32 %s4129_s21, 4  ;;  %s95_s0 = sshll.u32 %s4130_s1, 4  ;;  %s77_s22 = int_to_ptr.vmem [resolvable:$true] %s76_s22  ;;  %s96_s0 = int_to_ptr.vmem [resolvable:$true] %s95_s0 }
  0x47   :  { %s4035_s23 = scalar_lea.vmem %s77_s22, 32  ;;  %p4040_p3 = scmp.lt.s32.totalorder %s77_s22, %s77_s22 }
  0x48   :  { %p4036_p2 = scmp.ne.s32.totalorder %s77_s22, %s4035_s23  ;;  %p4041_p4 = scmp.lt.s32.totalorder %s4035_s23, %s4035_s23 }
  0x4a   :  { %p4042_p5 = por %p4041_p4, %p4040_p3 }
  0x4c   :  { %p4043_p6 = pnand %p4042_p5, %p4036_p2 }
  0x4e   :  { %4046 = shalt.err (!%p4043_p6)
}
  0x4f   :  { %79 = dma.hbm_to_vmem [thread:$0]  %s4378_s5, 32, %s77_s22, [#allocation9]  }
  0x50   :  { %s4055_s26 = scalar_lea.vmem %s96_s0, 8192  ;;  %p4060_p8 = scmp.lt.s32.totalorder %s96_s0, %s96_s0 }
  0x51   :  { %p4056_p7 = scmp.ne.s32.totalorder %s96_s0, %s4055_s26  ;;  %p4061_p9 = scmp.lt.s32.totalorder %s4055_s26, %s4055_s26 }
  0x53   :  { %p4062_p10 = por %p4061_p9, %p4060_p8 }
  0x55   :  { %p4063_p11 = pnand %p4062_p10, %p4056_p7 }
  0x57   :  { %4066 = shalt.err (!%p4063_p11)
}
  0x58   :  { %s4131_s3 = smov 256   ;;  %s4132_s27 = smov 16  }
  0x59   :  { %101 = dma.hbm_to_vmem [thread:$0]  %s4380_s7, 8192, %s96_s0, [#allocation12], %s4131_s3, %s4131_s3, %s4132_s27  }
  0x5a   :  { %s4133_s29 = smov [#allocation16]  }
  0x5b   :  { %s121_s30 = sshll.u32 %s4133_s29, 4  ;;  %s122_s30 = int_to_ptr.vmem [resolvable:$true] %s121_s30 }
  0x5c   :  { %s4075_s6 = scalar_lea.vmem %s122_s30, 28672  ;;  %p4080_p13 = scmp.lt.s32.totalorder %s122_s30, %s122_s30 }
  0x5d   :  { %p4076_p12 = scmp.ne.s32.totalorder %s122_s30, %s4075_s6  ;;  %p4081_p0 = scmp.lt.s32.totalorder %s4075_s6, %s4075_s6 }
  0x5f   :  { %p4082_p1 = por %p4081_p0, %p4080_p13 }
  0x61   :  { %p4083_p2 = pnand %p4082_p1, %p4076_p12 }
  0x63   :  { %4086 = shalt.err (!%p4083_p2)
}
  0x64   :  { %s4134_s5 = smov 448   ;;  %s4135_s14 = smov 28  }
  0x65   :  { %127 = dma.hbm_to_vmem [thread:$0]  %s4384_s11, 28672, %s122_s30, [#allocation15], %s4134_s5, %s4134_s5, %s4135_s14  }
  0x66   :  { %4107 = dma.done.wait [#allocation3], 128  }
  0x67   :  { %4108 = vsyncadd [#allocation3], 4294967168 }
  0x68   :  { %4109 = dma.done.wait [#allocation6], 3072  }
  0x69   :  { %4110 = vsyncadd [#allocation6], 4294964224 }
  0x6a   :  { %4111 = dma.done.wait [#allocation9], 64  }
  0x6b   :  { %4112 = vsyncadd [#allocation9], 4294967232 }
  0x6c   :  { %4113 = dma.done.wait [#allocation12], 8224  }
  0x6d   :  { %4114 = vsyncadd [#allocation12], 4294959072 }
  0x6e   :  { %4115 = dma.done.wait [#allocation15], 28736  }
  0x6f   :  { %4116 = vsyncadd [#allocation15], 4294938560  ;;  %v4136_v0 = vmov 0.0   ;;  %vm4137_vm0 = vmmov 0   ;;  %v3433_v1 = vld [vmem:[#allocation5 + $0x38] sm:$0xff]   ;;  %v3434_v2 = vld [vmem:[#allocation5 + $0x30] sm:$0xff]  }
  0x70   :  { %3391 = vmatprep.subr.bf16.mxu0 %v4136_v0  ;;  %3407 = vmatprep.mubr.msk.bf16.mxu0 %vm4137_vm0, %v4136_v0  ;;  %v3435_v3 = vld [vmem:[#allocation5 + $0x28] sm:$0xff]   ;;  %v3441_v4 = vld [vmem:[#allocation7 + $0x74] ss:$8 sps:$4 sm:$0xff]   ;;  %v3443_v5 = vld [vmem:[#allocation7 + $0x70] ss:$8 sps:$4 sm:$0xff]   ;;  %v4138_v27 = vmov 0  }
  0x71   :  { %3392 = vmatpush3.bf16.msra.mxu0 %v3433_v1  ;;  %v3436_v6 = vld [vmem:[#allocation5 + $0x20] sm:$0xff]   ;;  %381 = vmatprep.subr.bf16.mxu1 %v3441_v4  ;;  %v3447_v9 = vld [vmem:[#allocation7 + $0x54] ss:$8 sps:$4 sm:$0xff]   ;;  %v3449_v11 = vld [vmem:[#allocation7 + $0x50] ss:$8 sps:$4 sm:$0xff]  }
  0x72   :  { %3393 = vmatprep.subr.bf16.mxu0 %v4136_v0  ;;  %v3444_v7 = vld [vmem:[#allocation7 + $0x64] ss:$8 sps:$4 sm:$0xff]   ;;  %382 = vmatpush1.bf16.msra.mxu1 %v3443_v5  ;;  %v3446_v8 = vld [vmem:[#allocation7 + $0x60] ss:$8 sps:$4 sm:$0xff]   ;;  %v3437_v10 = vld [vmem:[#allocation5 + $0x18] sm:$0xff]  }
  0x73   :  { %383 = vmatprep.subr.bf16.mxu1 %v3444_v7  ;;  %v3438_v12 = vld [vmem:[#allocation5 + $0x10] sm:$0xff]   ;;  %v3450_v13 = vld [vmem:[#allocation7 + $0x44] ss:$8 sps:$4 sm:$0xff]   ;;  %v3452_v14 = vld [vmem:[#allocation7 + $0x40] ss:$8 sps:$4 sm:$0xff]   ;;  %413 = vmatprep.mubr.bf16.mxu1 %v4138_v27 }
  0x74   :  { %v3453_v15 = vld [vmem:[#allocation7 + $0x34] ss:$8 sps:$4 sm:$0xff]   ;;  %v3439_v16 = vld [vmem:[#allocation5 + $0x8] sm:$0xff]   ;;  %v3455_v17 = vld [vmem:[#allocation7 + $0x30] ss:$8 sps:$4 sm:$0xff]  }
  0x75   :  { %3394 = vmatpush3.bf16.msra.mxu0 %v3434_v2  ;;  %v3456_v18 = vld [vmem:[#allocation7 + $0x24] ss:$8 sps:$4 sm:$0xff]   ;;  %v158_v20 = vld [vmem:[#allocation2] sm:$0xff]  ;;  %v3458_v21 = vld [vmem:[#allocation7 + $0x20] ss:$8 sps:$4 sm:$0xff]  }
  0x76   :  { %3395 = vmatprep.subr.bf16.mxu0 %v4136_v0  ;;  %384 = vmatpush1.bf16.msra.mxu1 %v3446_v8  ;;  %v3440_v19 = vld [vmem:[#allocation5] sm:$0xff]   ;;  %v3459_v22 = vld [vmem:[#allocation7 + $0x14] ss:$8 sps:$4 sm:$0xff]   ;;  %v159_v23 = vpack.c.bf16 %v158_v20, %v158_v20  ;;  %v3461_v24 = vld [vmem:[#allocation7 + $0x10] ss:$8 sps:$4 sm:$0xff]  }
  0x77   :  { %385 = vmatprep.subr.bf16.mxu1 %v3447_v9  ;;  %v3462_v25 = vld [vmem:[#allocation7 + $0x4] ss:$8 sps:$4 sm:$0xff]   ;;  %v3464_v26 = vld [vmem:[#allocation7] ss:$8 sps:$4 sm:$0xff]   ;;  %v3025_v28 = vld [vmem:[%s4375_s2] ss:$0 sm:$0xff] }
  0x78   :  { %v3467_v36 = vld [vmem:[#allocation13 + $0xe4] ss:$16 sps:$4 sm:$0xff]   ;;  %v3470_v37 = vld [vmem:[#allocation13 + $0xec] ss:$16 sps:$4 sm:$0xff]   ;;  %v3465_v38 = vld [vmem:[#allocation13 + $0xe0] ss:$16 sps:$4 sm:$0xff]  }
  0x79   :  { %3396 = vmatpush3.bf16.msra.mxu0 %v3435_v3  ;;  %v3468_v39 = vld [vmem:[#allocation13 + $0xe8] ss:$16 sps:$4 sm:$0xff]   ;;  %v3473_v40 = vld [vmem:[#allocation13 + $0xc4] ss:$16 sps:$4 sm:$0xff]   ;;  %v3476_v41 = vld [vmem:[#allocation13 + $0xcc] ss:$16 sps:$4 sm:$0xff]  }
  0x7a   :  { %3397 = vmatprep.subr.bf16.mxu0 %v4136_v0  ;;  %386 = vmatpush1.bf16.msra.mxu1 %v3449_v11  ;;  %v3471_v42 = vld [vmem:[#allocation13 + $0xc0] ss:$16 sps:$4 sm:$0xff]   ;;  %v3474_v43 = vld [vmem:[#allocation13 + $0xc8] ss:$16 sps:$4 sm:$0xff]   ;;  %v3479_v44 = vld [vmem:[#allocation13 + $0xa4] ss:$16 sps:$4 sm:$0xff]  }
  0x7b   :  { %387 = vmatprep.subr.bf16.mxu1 %v3450_v13  ;;  %v3482_v45 = vld [vmem:[#allocation13 + $0xac] ss:$16 sps:$4 sm:$0xff]   ;;  %v3477_v46 = vld [vmem:[#allocation13 + $0xa0] ss:$16 sps:$4 sm:$0xff]   ;;  %v3480_v47 = vld [vmem:[#allocation13 + $0xa8] ss:$16 sps:$4 sm:$0xff]  }
  0x7c   :  { %v3485_v48 = vld [vmem:[#allocation13 + $0x84] ss:$16 sps:$4 sm:$0xff]   ;;  %v3488_v49 = vld [vmem:[#allocation13 + $0x8c] ss:$16 sps:$4 sm:$0xff]   ;;  %v3483_v50 = vld [vmem:[#allocation13 + $0x80] ss:$16 sps:$4 sm:$0xff]  }
  0x7d   :  { %3398 = vmatpush3.bf16.msra.mxu0 %v3436_v6  ;;  %v3486_v51 = vld [vmem:[#allocation13 + $0x88] ss:$16 sps:$4 sm:$0xff]   ;;  %v3491_v52 = vld [vmem:[#allocation13 + $0x64] ss:$16 sps:$4 sm:$0xff]   ;;  %v3494_v53 = vld [vmem:[#allocation13 + $0x6c] ss:$16 sps:$4 sm:$0xff]  }
  0x7e   :  { %3399 = vmatprep.subr.bf16.mxu0 %v4136_v0  ;;  %388 = vmatpush1.bf16.msra.mxu1 %v3452_v14  ;;  %v3489_v54 = vld [vmem:[#allocation13 + $0x60] ss:$16 sps:$4 sm:$0xff]   ;;  %v3492_v55 = vld [vmem:[#allocation13 + $0x68] ss:$16 sps:$4 sm:$0xff]   ;;  %v3497_v56 = vld [vmem:[#allocation13 + $0x44] ss:$16 sps:$4 sm:$0xff]  }
  0x7f   :  { %389 = vmatprep.subr.bf16.mxu1 %v3453_v15  ;;  %v3500_v57 = vld [vmem:[#allocation13 + $0x4c] ss:$16 sps:$4 sm:$0xff]   ;;  %v3495_v58 = vld [vmem:[#allocation13 + $0x40] ss:$16 sps:$4 sm:$0xff]   ;;  %v3498_v59 = vld [vmem:[#allocation13 + $0x48] ss:$16 sps:$4 sm:$0xff]  }
  0x80   :  { %v3503_v60 = vld [vmem:[#allocation13 + $0x24] ss:$16 sps:$4 sm:$0xff]   ;;  %v3506_v61 = vld [vmem:[#allocation13 + $0x2c] ss:$16 sps:$4 sm:$0xff]   ;;  %v3501_v62 = vld [vmem:[#allocation13 + $0x20] ss:$16 sps:$4 sm:$0xff]  }
  0x81   :  { %3400 = vmatpush3.bf16.msra.mxu0 %v3437_v10  ;;  %v3504_v63 = vld [vmem:[#allocation13 + $0x28] ss:$16 sps:$4 sm:$0xff]   ;;  %v3512_v1 = vld [vmem:[#allocation13 + $0xc] ss:$16 sps:$4 sm:$0xff]   ;;  %v3507_v2 = vld [vmem:[#allocation13] ss:$16 sps:$4 sm:$0xff]  }
  0x82   :  { %3401 = vmatprep.subr.bf16.mxu0 %v4136_v0  ;;  %390 = vmatpush1.bf16.msra.mxu1 %v3455_v17  ;;  %v3510_v3 = vld [vmem:[#allocation13 + $0x8] ss:$16 sps:$4 sm:$0xff]   ;;  %v3515_v4 = vld [vmem:[#allocation13 + $0x1e4] ss:$16 sps:$4 sm:$0xff]   ;;  %v3518_v5 = vld [vmem:[#allocation13 + $0x1ec] ss:$16 sps:$4 sm:$0xff]  }
  0x83   :  { %391 = vmatprep.subr.bf16.mxu1 %v3456_v18  ;;  %v3513_v6 = vld [vmem:[#allocation13 + $0x1e0] ss:$16 sps:$4 sm:$0xff]   ;;  %v3516_v7 = vld [vmem:[#allocation13 + $0x1e8] ss:$16 sps:$4 sm:$0xff]   ;;  %v3521_v8 = vld [vmem:[#allocation13 + $0x1c4] ss:$16 sps:$4 sm:$0xff]  }
  0x84   :  { %v3524_v9 = vld [vmem:[#allocation13 + $0x1cc] ss:$16 sps:$4 sm:$0xff]   ;;  %v3519_v10 = vld [vmem:[#allocation13 + $0x1c0] ss:$16 sps:$4 sm:$0xff]   ;;  %v3522_v11 = vld [vmem:[#allocation13 + $0x1c8] ss:$16 sps:$4 sm:$0xff]  }
  0x85   :  { %3402 = vmatpush3.bf16.msra.mxu0 %v3438_v12  ;;  %v3527_v12 = vld [vmem:[#allocation13 + $0x1a4] ss:$16 sps:$4 sm:$0xff]   ;;  %v3530_v13 = vld [vmem:[#allocation13 + $0x1ac] ss:$16 sps:$4 sm:$0xff]   ;;  %v3525_v14 = vld [vmem:[#allocation13 + $0x1a0] ss:$16 sps:$4 sm:$0xff]  }
  0x86   :  { %3403 = vmatprep.subr.bf16.mxu0 %v4136_v0  ;;  %392 = vmatpush1.bf16.msra.mxu1 %v3458_v21  ;;  %v3528_v15 = vld [vmem:[#allocation13 + $0x1a8] ss:$16 sps:$4 sm:$0xff]   ;;  %v3536_v17 = vld [vmem:[#allocation13 + $0x18c] ss:$16 sps:$4 sm:$0xff]   ;;  %v3531_v18 = vld [vmem:[#allocation13 + $0x180] ss:$16 sps:$4 sm:$0xff]  }
  0x87   :  { %393 = vmatprep.subr.bf16.mxu1 %v3459_v22  ;;  %v3539_v20 = vld [vmem:[#allocation13 + $0x164] ss:$16 sps:$4 sm:$0xff]   ;;  %v3542_v21 = vld [vmem:[#allocation13 + $0x16c] ss:$16 sps:$4 sm:$0xff]   ;;  %v3537_v22 = vld [vmem:[#allocation13 + $0x160] ss:$16 sps:$4 sm:$0xff]  }
  0x88   :  { %v3546_v27 = vld [vmem:[#allocation13 + $0x148] ss:$16 sps:$4 sm:$0xff]  }
  0x89   :  { %3404 = vmatpush3.bf16.msra.mxu0 %v3439_v16  ;;  %v3533_v16 = vld [vmem:[#allocation13 + $0x184] ss:$16 sps:$4 sm:$0xff]  }
  0x8a   :  { %3405 = vmatprep.subr.bf16.mxu0 %v4136_v0  ;;  %394 = vmatpush1.bf16.msra.mxu1 %v3461_v24  ;;  %v3509_v0 = vld [vmem:[#allocation13 + $0x4] ss:$16 sps:$4 sm:$0xff]  }
  0x8b   :  { %395 = vmatprep.subr.bf16.mxu1 %v3462_v25  ;;  %v3545_v24 = vld [vmem:[#allocation13 + $0x144] ss:$16 sps:$4 sm:$0xff]   ;;  %v3548_v25 = vld [vmem:[#allocation13 + $0x14c] ss:$16 sps:$4 sm:$0xff]  }
  0x8d   :  { %3406 = vmatpush3.bf16.msra.mxu0 %v3440_v19  ;;  %v3534_v19 = vld [vmem:[#allocation13 + $0x188] ss:$16 sps:$4 sm:$0xff]  }
  0x8e   :  { %396 = vmatpush1.bf16.msra.mxu1 %v3464_v26  ;;  %939 = vmatprep.subr.bf16.mxu0 %v3467_v36  ;;  %v3543_v26 = vld [vmem:[#allocation13 + $0x140] ss:$16 sps:$4 sm:$0xff]   ;;  %v291_v36 = vlaneseq }
  0x8f   :  { %980 = vmatprep.subr.bf16.mxu1 %v3470_v37 }
  0x90   :  { %3408 = vmatmul.mubr.bf16.vlgmr.msra.gmra.mxu0 %v159_v23  ;;  %v3540_v23 = vld [vmem:[#allocation13 + $0x168] ss:$16 sps:$4 sm:$0xff]   ;;  %v4241_v37 = vshrl.u32 %v291_v36, 7 }
  0x91   :  { %940 = vmatpush1.bf16.msra.mxu0 %v3465_v38 }
  0x92   :  { %941 = vmatprep.subr.bf16.mxu0 %v3473_v40  ;;  %v4244_v38 = vsub.s32 0, %v4241_v37  ;;  %v4247_v40 = vsub.s32 1, %v4241_v37 }
  0x95   :  { %942 = vmatpush1.bf16.msra.mxu0 %v3471_v42 }
  0x96   :  { %943 = vmatprep.subr.bf16.mxu0 %v3479_v44 }
  0x99   :  { %944 = vmatpush1.bf16.msra.mxu0 %v3477_v46 }
  0x9a   :  { %945 = vmatprep.subr.bf16.mxu0 %v3485_v48 }
  0x9d   :  { %946 = vmatpush1.bf16.msra.mxu0 %v3483_v50 }
  0x9e   :  { %947 = vmatprep.subr.bf16.mxu0 %v3491_v52 }
  0xa1   :  { %948 = vmatpush1.bf16.msra.mxu0 %v3489_v54 }
  0xa2   :  { %949 = vmatprep.subr.bf16.mxu0 %v3497_v56 }
  0xa5   :  { %950 = vmatpush1.bf16.msra.mxu0 %v3495_v58 }
  0xa6   :  { %951 = vmatprep.subr.bf16.mxu0 %v3503_v60 }
  0xa9   :  { %952 = vmatpush1.bf16.msra.mxu0 %v3501_v62 }
  0xaa   :  { %953 = vmatprep.subr.bf16.mxu0 %v3509_v0 }
  0xad   :  { %954 = vmatpush1.bf16.msra.mxu0 %v3507_v2 }
  0xae   :  { %955 = vmatprep.subr.bf16.mxu0 %v3515_v4 }
  0xb1   :  { %956 = vmatpush2.bf16.msra.mxu0 %v3513_v6 }
  0xb2   :  { %957 = vmatprep.subr.bf16.mxu0 %v3521_v8 }
  0xb5   :  { %958 = vmatpush2.bf16.msra.mxu0 %v3519_v10 }
  0xb6   :  { %959 = vmatprep.subr.bf16.mxu0 %v3527_v12 }
  0xb9   :  { %960 = vmatpush2.bf16.msra.mxu0 %v3525_v14 }
  0xba   :  { %961 = vmatprep.subr.bf16.mxu0 %v3533_v16 }
  0xbd   :  { %962 = vmatpush2.bf16.msra.mxu0 %v3531_v18 }
  0xbe   :  { %963 = vmatprep.subr.bf16.mxu0 %v3539_v20 }
  0xc1   :  { %964 = vmatpush2.bf16.msra.mxu0 %v3537_v22 }
  0xc2   :  { %965 = vmatprep.subr.bf16.mxu0 %v3545_v24 }
  0xc5   :  { %966 = vmatpush2.bf16.msra.mxu0 %v3543_v26 }
 0x150   :  { %v265_v29 = vpop.f32.mrf.mxu0 }
 0x151   :  { %v266_v30 = vadd.f32 %v3025_v28, %v265_v29  ;;  %v3551_v28 = vld [vmem:[#allocation13 + $0x124] ss:$16 sps:$4 sm:$0xff]   ;;  %v3554_v29 = vld [vmem:[#allocation13 + $0x12c] ss:$16 sps:$4 sm:$0xff]  }
 0x152   :  { %v3409_v31 = vpop.f32.mrf.mxu0  ;;  %967 = vmatprep.subr.bf16.mxu0 %v3551_v28 }
 0x153   :  { %v271_v32 = vmax.f32 %v266_v30, 0.0  ;;  %v3549_v30 = vld [vmem:[#allocation13 + $0x120] ss:$16 sps:$4 sm:$0xff]   ;;  %v3552_v31 = vld [vmem:[#allocation13 + $0x128] ss:$16 sps:$4 sm:$0xff]  }
 0x154   :  { %v268_v33 = vpop.f32.mrf.mxu0  ;;  %968 = vmatpush2.bf16.msra.mxu0 %v3549_v30 }
 0x155   :  { %v272_v34 = vpack.c.bf16 %v271_v32, %v271_v32  ;;  %v3557_v32 = vld [vmem:[#allocation13 + $0x104] ss:$16 sps:$4 sm:$0xff]   ;;  %v3560_v33 = vld [vmem:[#allocation13 + $0x10c] ss:$16 sps:$4 sm:$0xff]  }
 0x156   :  { %v3410_v35 = vpop.f32.mrf.mxu0  ;;  %969 = vmatprep.subr.bf16.mxu0 %v3557_v32 }
 0x157   :  { %414 = vmatmul.mubr.bf16.vlgmr.msra.gmra.mxu1 %v272_v34  ;;  %v3555_v34 = vld [vmem:[#allocation13 + $0x100] ss:$16 sps:$4 sm:$0xff]   ;;  %v3558_v35 = vld [vmem:[#allocation13 + $0x108] ss:$16 sps:$4 sm:$0xff]  }
 0x158   :  { %981 = vmatpush1.bf16.msra.mxu1 %v3468_v39  ;;  %970 = vmatpush2.bf16.msra.mxu0 %v3555_v34  ;;  %v289_v39 = vld [vmem:[#allocation8] sm:$0x3] }
 0x159   :  { %982 = vmatprep.subr.bf16.mxu1 %v3476_v41  ;;  %v294_v41 = vrot.slane %v289_v39, %v4244_v38  ;;  %v298_v42 = vrot.slane %v289_v39, %v4247_v40 }
 0x15c   :  { %983 = vmatpush1.bf16.msra.mxu1 %v3474_v43 }
 0x15d   :  { %984 = vmatprep.subr.bf16.mxu1 %v3482_v45 }
 0x160   :  { %985 = vmatpush1.bf16.msra.mxu1 %v3480_v47 }
 0x161   :  { %986 = vmatprep.subr.bf16.mxu1 %v3488_v49 }
 0x164   :  { %987 = vmatpush1.bf16.msra.mxu1 %v3486_v51 }
 0x165   :  { %988 = vmatprep.subr.bf16.mxu1 %v3494_v53 }
 0x168   :  { %989 = vmatpush1.bf16.msra.mxu1 %v3492_v55 }
 0x169   :  { %990 = vmatprep.subr.bf16.mxu1 %v3500_v57 }
 0x16c   :  { %991 = vmatpush1.bf16.msra.mxu1 %v3498_v59 }
 0x16d   :  { %992 = vmatprep.subr.bf16.mxu1 %v3506_v61 }
 0x170   :  { %993 = vmatpush1.bf16.msra.mxu1 %v3504_v63 }
 0x171   :  { %994 = vmatprep.subr.bf16.mxu1 %v3512_v1 }
 0x174   :  { %995 = vmatpush1.bf16.msra.mxu1 %v3510_v3 }
 0x175   :  { %996 = vmatprep.subr.bf16.mxu1 %v3518_v5 }
 0x178   :  { %997 = vmatpush2.bf16.msra.mxu1 %v3516_v7 }
 0x179   :  { %998 = vmatprep.subr.bf16.mxu1 %v3524_v9 }
 0x17c   :  { %999 = vmatpush2.bf16.msra.mxu1 %v3522_v11 }
 0x17d   :  { %1000 = vmatprep.subr.bf16.mxu1 %v3530_v13 }
 0x180   :  { %1001 = vmatpush2.bf16.msra.mxu1 %v3528_v15 }
 0x181   :  { %1002 = vmatprep.subr.bf16.mxu1 %v3536_v17 }
 0x184   :  { %1003 = vmatpush2.bf16.msra.mxu1 %v3534_v19 }
 0x185   :  { %1004 = vmatprep.subr.bf16.mxu1 %v3542_v21  ;;  %v4139_v21 = vmov 1966171168  }
 0x186   :  { %v466_v22 = vunpack.c.l.s4 %v4139_v21  ;;  %v3606_v21 = vld [vmem:[#allocation16 + $0x380] ss:$28 sps:$4 sm:$0xff]  }
 0x188   :  { %1005 = vmatpush2.bf16.msra.mxu1 %v3540_v23  ;;  %v467_v23 = vunpack.c.0.s8 %v466_v22  ;;  %v3611_v22 = vld [vmem:[#allocation16 + $0x34c] ss:$28 sps:$4 sm:$0xff]  }
 0x189   :  { %1006 = vmatprep.subr.bf16.mxu1 %v3548_v25 }
 0x18a   :  { %v4258_v25 = vsub.s32 %v467_v23, %v4241_v37  ;;  %v3614_v23 = vld [vmem:[#allocation16 + $0x6cc] ss:$28 sps:$4 sm:$0xff]  }
 0x18c   :  { %1007 = vmatpush2.bf16.msra.mxu1 %v3546_v27 }
 0x18d   :  { %1008 = vmatprep.subr.bf16.mxu1 %v3554_v29  ;;  %v457_v29 = vld [vmem:[#allocation10] sm:$0x3] }
 0x190   :  { %1009 = vmatpush2.bf16.msra.mxu1 %v3552_v31 }
 0x191   :  { %1010 = vmatprep.subr.bf16.mxu1 %v3560_v33 }
 0x194   :  { %1011 = vmatpush2.bf16.msra.mxu1 %v3558_v35 }
 0x217   :  { %v415_v43 = vpop.f32.mrf.mxu1 }
 0x218   :  { %v4251_v44 = vadd.f32 %v415_v43, %v294_v41  ;;  %v481_v41 = vld [vmem:[#allocation11] sm:$0x3] }
 0x219   :  { %v417_v45 = vpop.f32.mrf.mxu1 }
 0x21a   :  { %v422_v46 = vrot.slane %v4251_v44, 4  ;;  %v437_v47 = vmul.f32 %v4251_v44, %v4251_v44  ;;  %v418_v48 = vadd.f32 %v417_v45, %v298_v42 }
 0x21b   :  { %v419_v49 = vpop.f32.mrf.mxu1 }
 0x21c   :  { %v423_v50 = vadd.f32 %v422_v46, %v4251_v44  ;;  %v439_v51 = vrot.slane %v437_v47, 4  ;;  %v428_v52 = vrot.slane %v418_v48, 4  ;;  %v438_v53 = vmul.f32 %v418_v48, %v418_v48 }
 0x21d   :  { %v420_v54 = vpop.f32.mrf.mxu1 }
 0x21e   :  { %v424_v55 = vrot.slane %v423_v50, 2  ;;  %v440_v56 = vadd.f32 %v439_v51, %v437_v47  ;;  %v429_v57 = vadd.f32 %v428_v52, %v418_v48  ;;  %v445_v58 = vrot.slane %v438_v53, 4 }
 0x220   :  { %v425_v59 = vadd.f32 %v424_v55, %v423_v50  ;;  %v441_v60 = vrot.slane %v440_v56, 2  ;;  %v430_v61 = vrot.slane %v429_v57, 2  ;;  %v446_v62 = vadd.f32 %v445_v58, %v438_v53  ;;  %v3561_v58 = vld [vmem:[#allocation16 + $0x188] ss:$28 sps:$4 sm:$0xff]  }
 0x222   :  { %v426_v63 = vrot.slane %v425_v59, 1  ;;  %v442_v0 = vadd.f32 %v441_v60, %v440_v56  ;;  %v431_v1 = vadd.f32 %v430_v61, %v429_v57  ;;  %v447_v2 = vrot.slane %v446_v62, 2  ;;  %v3563_v56 = vld [vmem:[#allocation16 + $0x18c] ss:$28 sps:$4 sm:$0xff]  }
 0x223   :  { %v3566_v57 = vld [vmem:[#allocation16 + $0x50c] ss:$28 sps:$4 sm:$0xff]   ;;  %2666 = vmatprep.subr.bf16.mxu0 %v3563_v56  ;;  %v3653_v56 = vld [vmem:[#allocation16 + $0x1c4] ss:$28 sps:$4 sm:$0xff]  }
 0x224   :  { %v427_v3 = vadd.f32 %v426_v63, %v425_v59  ;;  %v443_v4 = vrot.slane %v442_v0, 1  ;;  %v432_v5 = vrot.slane %v431_v1, 1  ;;  %v448_v6 = vadd.f32 %v447_v2, %v446_v62  ;;  %2707 = vmatprep.subr.bf16.mxu1 %v3566_v57  ;;  %v3572_v59 = vld [vmem:[#allocation16 + $0x4d4] ss:$28 sps:$4 sm:$0xff]   ;;  %v3575_v62 = vld [vmem:[#allocation16 + $0x11c] ss:$28 sps:$4 sm:$0xff]  }
 0x225   :  { %v3567_v60 = vld [vmem:[#allocation16 + $0x150] ss:$28 sps:$4 sm:$0xff]   ;;  %v3578_v63 = vld [vmem:[#allocation16 + $0x49c] ss:$28 sps:$4 sm:$0xff]   ;;  %v3581_v2 = vld [vmem:[#allocation16 + $0xe4] ss:$28 sps:$4 sm:$0xff]  }
 0x226   :  { %v435_v7 = vmul.f32 0.125, %v427_v3  ;;  %v444_v8 = vadd.f32 %v443_v4, %v442_v0  ;;  %v433_v9 = vadd.f32 %v432_v5, %v431_v1  ;;  %v449_v10 = vrot.slane %v448_v6, 1  ;;  %v3570_v61 = vld [vmem:[#allocation16 + $0x4d0] ss:$28 sps:$4 sm:$0xff]   ;;  %v3573_v0 = vld [vmem:[#allocation16 + $0x118] ss:$28 sps:$4 sm:$0xff]  }
 0x227   :  { %v3576_v1 = vld [vmem:[#allocation16 + $0x498] ss:$28 sps:$4 sm:$0xff]   ;;  %v3584_v3 = vld [vmem:[#allocation16 + $0x464] ss:$28 sps:$4 sm:$0xff]  }
 0x228   :  { %v451_v11 = vmul.f32 0.125, %v444_v8  ;;  %v453_v12 = vmul.f32 %v435_v7, %v435_v7  ;;  %v450_v13 = vadd.f32 %v449_v10, %v448_v6  ;;  %v436_v14 = vmul.f32 0.125, %v433_v9  ;;  %v3579_v4 = vld [vmem:[#allocation16 + $0xe0] ss:$28 sps:$4 sm:$0xff]   ;;  %v3587_v6 = vld [vmem:[#allocation16 + $0xac] ss:$28 sps:$4 sm:$0xff]  }
 0x229   :  { %v3582_v5 = vld [vmem:[#allocation16 + $0x460] ss:$28 sps:$4 sm:$0xff]   ;;  %v3585_v8 = vld [vmem:[#allocation16 + $0xa8] ss:$28 sps:$4 sm:$0xff]   ;;  %v3593_v10 = vld [vmem:[#allocation16 + $0x74] ss:$28 sps:$4 sm:$0xff]  }
 0x22a   :  { %v455_v15 = vsub.f32 %v451_v11, %v453_v12  ;;  %v452_v16 = vmul.f32 0.125, %v450_v13  ;;  %v454_v17 = vmul.f32 %v436_v14, %v436_v14  ;;  %v3588_v9 = vld [vmem:[#allocation16 + $0x428] ss:$28 sps:$4 sm:$0xff]   ;;  %v3596_v11 = vld [vmem:[#allocation16 + $0x3f4] ss:$28 sps:$4 sm:$0xff]  }
 0x22b   :  { %v3591_v12 = vld [vmem:[#allocation16 + $0x70] ss:$28 sps:$4 sm:$0xff]   ;;  %v3656_v57 = vld [vmem:[#allocation16 + $0x544] ss:$28 sps:$4 sm:$0xff]  }
 0x22c   :  { %v458_v18 = vadd.f32 1e-05, %v455_v15  ;;  %v456_v19 = vsub.f32 %v452_v16, %v454_v17  ;;  %v3594_v13 = vld [vmem:[#allocation16 + $0x3f0] ss:$28 sps:$4 sm:$0xff]   ;;  %v3602_v15 = vld [vmem:[#allocation16 + $0x3bc] ss:$28 sps:$4 sm:$0xff]  }
 0x22d   :  { %v3597_v16 = vld [vmem:[#allocation16 + $0x38] ss:$28 sps:$4 sm:$0xff]  }
 0x22e   :  { %v459_v20 = vadd.f32 1e-05, %v456_v19  ;;  %3881 = vrsqrt.f32 %v458_v18  ;;  %v3600_v17 = vld [vmem:[#allocation16 + $0x3b8] ss:$28 sps:$4 sm:$0xff]   ;;  %v3605_v18 = vld [vmem:[#allocation16 + $0x4] ss:$28 sps:$4 sm:$0xff]  }
 0x22f   :  { %v3608_v19 = vld [vmem:[#allocation16 + $0x384] ss:$28 sps:$4 sm:$0xff]  }
 0x230   :  { %3883 = vrsqrt.f32 %v459_v20  ;;  %v3603_v20 = vld [vmem:[#allocation16] ss:$28 sps:$4 sm:$0xff]  }
 0x23b   :  { %v3882_v24 = vpop.eup %3881 }
 0x23d   :  { %v3884_v26 = vpop.eup %3883 }
 0x23e   :  { %v464_v27 = vcombine.low %v3882_v24, %v3884_v26  ;;  %v3609_v24 = vld [vmem:[#allocation16 + $0x348] ss:$28 sps:$4 sm:$0xff]  }
 0x23f   :  { %v3612_v26 = vld [vmem:[#allocation16 + $0x6c8] ss:$28 sps:$4 sm:$0xff]  }
 0x240   :  { %v471_v28 = vrot.slane %v464_v27, %v4258_v25  ;;  %v3617_v27 = vld [vmem:[#allocation16 + $0x314] ss:$28 sps:$4 sm:$0xff]  }
 0x242   :  { %v478_v30 = vrot.slane %v471_v28, %v4258_v25  ;;  %v3620_v28 = vld [vmem:[#allocation16 + $0x694] ss:$28 sps:$4 sm:$0xff]  }
 0x244   :  { %v480_v31 = vmul.f32 %v478_v30, %v457_v29  ;;  %v3615_v29 = vld [vmem:[#allocation16 + $0x310] ss:$28 sps:$4 sm:$0xff]  }
 0x245   :  { %v3618_v30 = vld [vmem:[#allocation16 + $0x690] ss:$28 sps:$4 sm:$0xff]  }
 0x246   :  { %v486_v32 = vrot.slane %v480_v31, %v4244_v38  ;;  %v490_v33 = vrot.slane %v480_v31, %v4247_v40  ;;  %v3623_v31 = vld [vmem:[#allocation16 + $0x2dc] ss:$28 sps:$4 sm:$0xff]  }
 0x248   :  { %v493_v34 = vmul.f32 %v486_v32, %v435_v7  ;;  %v494_v35 = vmul.f32 %v490_v33, %v436_v14  ;;  %v515_v45 = vmul.f32 %v490_v33, %v418_v48  ;;  %v514_v47 = vmul.f32 %v486_v32, %v4251_v44  ;;  %v3564_v48 = vld [vmem:[#allocation16 + $0x508] ss:$28 sps:$4 sm:$0xff]   ;;  %v3569_v44 = vld [vmem:[#allocation16 + $0x154] ss:$28 sps:$4 sm:$0xff]   ;;  %v3599_v14 = vld [vmem:[#allocation16 + $0x3c] ss:$28 sps:$4 sm:$0xff]  }
 0x249   :  { %v3590_v7 = vld [vmem:[#allocation16 + $0x42c] ss:$28 sps:$4 sm:$0xff]   ;;  %v3626_v32 = vld [vmem:[#allocation16 + $0x65c] ss:$28 sps:$4 sm:$0xff]  }
 0x24a   :  { %v497_v36 = vcombine.low %v493_v34, %v494_v35  ;;  %v3621_v33 = vld [vmem:[#allocation16 + $0x2d8] ss:$28 sps:$4 sm:$0xff]   ;;  %v3629_v35 = vld [vmem:[#allocation16 + $0x2a4] ss:$28 sps:$4 sm:$0xff]  }
 0x24b   :  { %v3624_v34 = vld [vmem:[#allocation16 + $0x658] ss:$28 sps:$4 sm:$0xff]  }
 0x24c   :  { %v504_v39 = vrot.slane %v497_v36, %v4258_v25  ;;  %v3632_v36 = vld [vmem:[#allocation16 + $0x624] ss:$28 sps:$4 sm:$0xff]  }
 0x24e   :  { %v511_v42 = vrot.slane %v504_v39, %v4258_v25  ;;  %v3627_v39 = vld [vmem:[#allocation16 + $0x2a0] ss:$28 sps:$4 sm:$0xff]  }
 0x250   :  { %v513_v43 = vsub.f32 %v481_v41, %v511_v42  ;;  %v3630_v41 = vld [vmem:[#allocation16 + $0x620] ss:$28 sps:$4 sm:$0xff]   ;;  %v3635_v42 = vld [vmem:[#allocation16 + $0x26c] ss:$28 sps:$4 sm:$0xff]  }
 0x252   :  { %v524_v46 = vrot.slane %v513_v43, %v4247_v40  ;;  %v520_v49 = vrot.slane %v513_v43, %v4244_v38  ;;  %v3638_v43 = vld [vmem:[#allocation16 + $0x5ec] ss:$28 sps:$4 sm:$0xff]  }
 0x254   :  { %v528_v50 = vadd.f32 %v524_v46, %v515_v45  ;;  %v527_v51 = vadd.f32 %v520_v49, %v514_v47  ;;  %v3633_v45 = vld [vmem:[#allocation16 + $0x268] ss:$28 sps:$4 sm:$0xff]   ;;  %v3641_v47 = vld [vmem:[#allocation16 + $0x234] ss:$28 sps:$4 sm:$0xff]  }
 0x255   :  { %v3636_v46 = vld [vmem:[#allocation16 + $0x5e8] ss:$28 sps:$4 sm:$0xff]   ;;  %v3639_v49 = vld [vmem:[#allocation16 + $0x230] ss:$28 sps:$4 sm:$0xff]  }
 0x256   :  { %v530_v52 = vmax.f32 %v528_v50, 0.0  ;;  %v529_v53 = vmax.f32 %v527_v51, 0.0  ;;  %v3642_v50 = vld [vmem:[#allocation16 + $0x5b0] ss:$28 sps:$4 sm:$0xff]  }
 0x257   :  { %v3644_v51 = vld [vmem:[#allocation16 + $0x5b4] ss:$28 sps:$4 sm:$0xff]  }
 0x258   :  { %v532_v54 = vpack.c.bf16 %v530_v52, %v530_v52  ;;  %v531_v55 = vpack.c.bf16 %v529_v53, %v529_v53  ;;  %v3647_v52 = vld [vmem:[#allocation16 + $0x1fc] ss:$28 sps:$4 sm:$0xff]  }
 0x259   :  { %v3650_v53 = vld [vmem:[#allocation16 + $0x57c] ss:$28 sps:$4 sm:$0xff]  }
 0x25a   :  { %971 = vmatprep.mubr.bf16.mxu0 %v532_v54  ;;  %1012 = vmatprep.mubr.bf16.mxu1 %v532_v54  ;;  %v3645_v54 = vld [vmem:[#allocation16 + $0x1f8] ss:$28 sps:$4 sm:$0xff]  }
 0x25b   :  { %972 = vmatmul.mubr.bf16.vlgmr.msra.gmra.mxu0 %v531_v55  ;;  %1013 = vmatmul.mubr.bf16.vlgmr.msra.gmra.mxu1 %v531_v55  ;;  %v3648_v55 = vld [vmem:[#allocation16 + $0x578] ss:$28 sps:$4 sm:$0xff]  }
 0x25c   :  { %2667 = vmatpush1.bf16.msra.mxu0 %v3561_v58  ;;  %2708 = vmatpush1.bf16.msra.mxu1 %v3564_v48  ;;  %v3651_v58 = vld [vmem:[#allocation16 + $0x1c0] ss:$28 sps:$4 sm:$0xff]  }
 0x25d   :  { %2668 = vmatprep.subr.bf16.mxu0 %v3569_v44  ;;  %2709 = vmatprep.subr.bf16.mxu1 %v3572_v59  ;;  %v3654_v48 = vld [vmem:[#allocation16 + $0x540] ss:$28 sps:$4 sm:$0xff]   ;;  %v3659_v44 = vld [vmem:[#allocation16 + $0x194] ss:$28 sps:$4 sm:$0xff]  }
 0x25e   :  { %v3662_v59 = vld [vmem:[#allocation16 + $0x514] ss:$28 sps:$4 sm:$0xff]  }
 0x260   :  { %2669 = vmatpush1.bf16.msra.mxu0 %v3567_v60  ;;  %2710 = vmatpush1.bf16.msra.mxu1 %v3570_v61  ;;  %v4270_v60 = vsub.s32 2, %v4241_v37  ;;  %v597_v61 = vld [vmem:[%s4381_s8] sm:$0xf] }
 0x261   :  { %2670 = vmatprep.subr.bf16.mxu0 %v3575_v62  ;;  %2711 = vmatprep.subr.bf16.mxu1 %v3578_v63  ;;  %v4276_v62 = vsub.s32 3, %v4241_v37  ;;  %v602_v63 = vrot.slane %v597_v61, %v4244_v38 }
 0x264   :  { %2671 = vmatpush1.bf16.msra.mxu0 %v3573_v0  ;;  %2712 = vmatpush1.bf16.msra.mxu1 %v3576_v1  ;;  %v610_v0 = vrot.slane %v597_v61, %v4270_v60 }
 0x265   :  { %2672 = vmatprep.subr.bf16.mxu0 %v3581_v2  ;;  %2713 = vmatprep.subr.bf16.mxu1 %v3584_v3  ;;  %v606_v3 = vrot.slane %v597_v61, %v4247_v40 }
 0x268   :  { %2673 = vmatpush1.bf16.msra.mxu0 %v3579_v4  ;;  %2714 = vmatpush1.bf16.msra.mxu1 %v3582_v5  ;;  %v614_v4 = vrot.slane %v597_v61, %v4276_v62 }
 0x269   :  { %2674 = vmatprep.subr.bf16.mxu0 %v3587_v6  ;;  %2715 = vmatprep.subr.bf16.mxu1 %v3590_v7 }
 0x26c   :  { %2675 = vmatpush1.bf16.msra.mxu0 %v3585_v8  ;;  %2716 = vmatpush1.bf16.msra.mxu1 %v3588_v9 }
 0x26d   :  { %2676 = vmatprep.subr.bf16.mxu0 %v3593_v10  ;;  %2717 = vmatprep.subr.bf16.mxu1 %v3596_v11 }
 0x270   :  { %2677 = vmatpush1.bf16.msra.mxu0 %v3591_v12  ;;  %2718 = vmatpush1.bf16.msra.mxu1 %v3594_v13 }
 0x271   :  { %2678 = vmatprep.subr.bf16.mxu0 %v3599_v14  ;;  %2719 = vmatprep.subr.bf16.mxu1 %v3602_v15 }
 0x274   :  { %2679 = vmatpush1.bf16.msra.mxu0 %v3597_v16  ;;  %2720 = vmatpush1.bf16.msra.mxu1 %v3600_v17 }
 0x275   :  { %2680 = vmatprep.subr.bf16.mxu0 %v3605_v18  ;;  %2721 = vmatprep.subr.bf16.mxu1 %v3608_v19 }
 0x278   :  { %2681 = vmatpush1.bf16.msra.mxu0 %v3603_v20  ;;  %2722 = vmatpush1.bf16.msra.mxu1 %v3606_v21 }
 0x279   :  { %2682 = vmatprep.subr.bf16.mxu0 %v3611_v22  ;;  %2723 = vmatprep.subr.bf16.mxu1 %v3614_v23 }
 0x27c   :  { %2683 = vmatpush2.bf16.msra.mxu0 %v3609_v24  ;;  %2724 = vmatpush2.bf16.msra.mxu1 %v3612_v26 }
 0x27d   :  { %2684 = vmatprep.subr.bf16.mxu0 %v3617_v27  ;;  %2725 = vmatprep.subr.bf16.mxu1 %v3620_v28 }
 0x280   :  { %2685 = vmatpush2.bf16.msra.mxu0 %v3615_v29  ;;  %2726 = vmatpush2.bf16.msra.mxu1 %v3618_v30 }
 0x281   :  { %2686 = vmatprep.subr.bf16.mxu0 %v3623_v31  ;;  %2727 = vmatprep.subr.bf16.mxu1 %v3626_v32 }
 0x284   :  { %2687 = vmatpush2.bf16.msra.mxu0 %v3621_v33  ;;  %2728 = vmatpush2.bf16.msra.mxu1 %v3624_v34 }
 0x285   :  { %2688 = vmatprep.subr.bf16.mxu0 %v3629_v35  ;;  %2729 = vmatprep.subr.bf16.mxu1 %v3632_v36 }
 0x288   :  { %2689 = vmatpush2.bf16.msra.mxu0 %v3627_v39  ;;  %2730 = vmatpush2.bf16.msra.mxu1 %v3630_v41 }
 0x289   :  { %2690 = vmatprep.subr.bf16.mxu0 %v3635_v42  ;;  %2731 = vmatprep.subr.bf16.mxu1 %v3638_v43 }
 0x28c   :  { %2691 = vmatpush2.bf16.msra.mxu0 %v3633_v45  ;;  %2732 = vmatpush2.bf16.msra.mxu1 %v3636_v46 }
 0x28d   :  { %2692 = vmatprep.subr.bf16.mxu0 %v3641_v47  ;;  %2733 = vmatprep.subr.bf16.mxu1 %v3644_v51 }
 0x290   :  { %2693 = vmatpush2.bf16.msra.mxu0 %v3639_v49  ;;  %2734 = vmatpush2.bf16.msra.mxu1 %v3642_v50 }
 0x291   :  { %2694 = vmatprep.subr.bf16.mxu0 %v3647_v52  ;;  %2735 = vmatprep.subr.bf16.mxu1 %v3650_v53 }
 0x294   :  { %2695 = vmatpush2.bf16.msra.mxu0 %v3645_v54  ;;  %2736 = vmatpush2.bf16.msra.mxu1 %v3648_v55 }
 0x295   :  { %2696 = vmatprep.subr.bf16.mxu0 %v3653_v56  ;;  %2737 = vmatprep.subr.bf16.mxu1 %v3656_v57 }
 0x298   :  { %2697 = vmatpush2.bf16.msra.mxu0 %v3651_v58  ;;  %2738 = vmatpush2.bf16.msra.mxu1 %v3654_v48 }
 0x299   :  { %2748 = vmatprep.subr.bf16.mxu0 %v3659_v44  ;;  %2789 = vmatprep.subr.bf16.mxu1 %v3662_v59 }
 0x31b   :  { %v973_v1 = vpop.f32.mrf.mxu0  ;;  %v1014_v2 = vpop.f32.mrf.mxu1 }
 0x31c   :  { %v4282_v5 = vadd.f32 %v973_v1, %v602_v63  ;;  %v4284_v6 = vadd.f32 %v1014_v2, %v610_v0 }
 0x31d   :  { %v975_v7 = vpop.f32.mrf.mxu0  ;;  %v1016_v8 = vpop.f32.mrf.mxu1 }
 0x31e   :  { %v1021_v9 = vrot.slane %v4282_v5, 4  ;;  %v1049_v10 = vmul.f32 %v4282_v5, %v4282_v5  ;;  %v1033_v11 = vrot.slane %v4284_v6, 4  ;;  %v1051_v12 = vmul.f32 %v4284_v6, %v4284_v6 }
 0x31f   :  { %v4292_v13 = vadd.f32 %v975_v7, %v606_v3  ;;  %v4294_v14 = vadd.f32 %v1016_v8, %v614_v4  ;;  %v977_v15 = vpop.f32.mrf.mxu0  ;;  %v1018_v16 = vpop.f32.mrf.mxu1 }
 0x320   :  { %v1022_v17 = vadd.f32 %v1021_v9, %v4282_v5  ;;  %v1053_v18 = vrot.slane %v1049_v10, 4  ;;  %v1034_v19 = vadd.f32 %v1033_v11, %v4284_v6  ;;  %v1065_v20 = vrot.slane %v1051_v12, 4 }
 0x321   :  { %v1027_v21 = vrot.slane %v4292_v13, 4  ;;  %v1050_v22 = vmul.f32 %v4292_v13, %v4292_v13  ;;  %v1039_v23 = vrot.slane %v4294_v14, 4  ;;  %v1052_v24 = vmul.f32 %v4294_v14, %v4294_v14  ;;  %v978_v26 = vpop.f32.mrf.mxu0  ;;  %v1019_v27 = vpop.f32.mrf.mxu1 }
 0x322   :  { %v1023_v28 = vrot.slane %v1022_v17, 2  ;;  %v1054_v29 = vadd.f32 %v1053_v18, %v1049_v10  ;;  %v1035_v30 = vrot.slane %v1034_v19, 2  ;;  %v1066_v31 = vadd.f32 %v1065_v20, %v1051_v12 }
 0x323   :  { %v1028_v32 = vadd.f32 %v1027_v21, %v4292_v13  ;;  %v1059_v33 = vrot.slane %v1050_v22, 4  ;;  %v1040_v34 = vadd.f32 %v1039_v23, %v4294_v14  ;;  %v1071_v35 = vrot.slane %v1052_v24, 4 }
 0x324   :  { %v1024_v36 = vadd.f32 %v1023_v28, %v1022_v17  ;;  %v1055_v39 = vrot.slane %v1054_v29, 2  ;;  %v1036_v41 = vadd.f32 %v1035_v30, %v1034_v19  ;;  %v1067_v42 = vrot.slane %v1066_v31, 2 }
 0x325   :  { %v1029_v43 = vrot.slane %v1028_v32, 2  ;;  %v1060_v45 = vadd.f32 %v1059_v33, %v1050_v22  ;;  %v1041_v46 = vrot.slane %v1040_v34, 2  ;;  %v1072_v47 = vadd.f32 %v1071_v35, %v1052_v24 }
 0x326   :  { %v1025_v49 = vrot.slane %v1024_v36, 1  ;;  %v1056_v50 = vadd.f32 %v1055_v39, %v1054_v29  ;;  %v1037_v51 = vrot.slane %v1036_v41, 1  ;;  %v1068_v52 = vadd.f32 %v1067_v42, %v1066_v31 }
 0x327   :  { %v1030_v53 = vadd.f32 %v1029_v43, %v1028_v32  ;;  %v1061_v54 = vrot.slane %v1060_v45, 2  ;;  %v1042_v55 = vadd.f32 %v1041_v46, %v1040_v34  ;;  %v1073_v56 = vrot.slane %v1072_v47, 2 }
 0x328   :  { %v1026_v57 = vadd.f32 %v1025_v49, %v1024_v36  ;;  %v1057_v58 = vrot.slane %v1056_v50, 1  ;;  %v1038_v48 = vadd.f32 %v1037_v51, %v1036_v41  ;;  %v1069_v44 = vrot.slane %v1068_v52, 1 }
 0x329   :  { %v1031_v59 = vrot.slane %v1030_v53, 1  ;;  %v1062_v61 = vadd.f32 %v1061_v54, %v1060_v45  ;;  %v1043_v63 = vrot.slane %v1042_v55, 1  ;;  %v1074_v0 = vadd.f32 %v1073_v56, %v1072_v47  ;;  %v1089_v47 = vld [vmem:[%s4382_s9] sm:$0xf] }
 0x32a   :  { %v1045_v1 = vmul.f32 0.125, %v1026_v57  ;;  %v1058_v2 = vadd.f32 %v1057_v58, %v1056_v50  ;;  %v1047_v3 = vmul.f32 0.125, %v1038_v48  ;;  %v1070_v4 = vadd.f32 %v1069_v44, %v1068_v52 }
 0x32b   :  { %v1032_v7 = vadd.f32 %v1031_v59, %v1030_v53  ;;  %v1063_v8 = vrot.slane %v1062_v61, 1  ;;  %v1044_v9 = vadd.f32 %v1043_v63, %v1042_v55  ;;  %v1075_v10 = vrot.slane %v1074_v0, 1 }
 0x32c   :  { %v1077_v11 = vmul.f32 0.125, %v1058_v2  ;;  %v1081_v12 = vmul.f32 %v1045_v1, %v1045_v1  ;;  %v1079_v15 = vmul.f32 0.125, %v1070_v4  ;;  %v1083_v16 = vmul.f32 %v1047_v3, %v1047_v3 }
 0x32d   :  { %v1046_v17 = vmul.f32 0.125, %v1032_v7  ;;  %v1064_v18 = vadd.f32 %v1063_v8, %v1062_v61  ;;  %v1048_v19 = vmul.f32 0.125, %v1044_v9  ;;  %v1076_v20 = vadd.f32 %v1075_v10, %v1074_v0  ;;  %v1128_v0 = vld [vmem:[#allocation14] sm:$0xf] }
 0x32e   :  { %v1085_v21 = vsub.f32 %v1077_v11, %v1081_v12  ;;  %v1087_v22 = vsub.f32 %v1079_v15, %v1083_v16 }
 0x32f   :  { %v1078_v23 = vmul.f32 0.125, %v1064_v18  ;;  %v1082_v24 = vmul.f32 %v1046_v17, %v1046_v17  ;;  %v1080_v26 = vmul.f32 0.125, %v1076_v20  ;;  %v1084_v27 = vmul.f32 %v1048_v19, %v1048_v19 }
 0x330   :  { %v1090_v28 = vadd.f32 1e-05, %v1085_v21  ;;  %v1092_v29 = vadd.f32 1e-05, %v1087_v22  ;;  %v3660_v21 = vld [vmem:[#allocation16 + $0x510] ss:$28 sps:$4 sm:$0xff]  }
 0x331   :  { %v1086_v30 = vsub.f32 %v1078_v23, %v1082_v24  ;;  %v1088_v31 = vsub.f32 %v1080_v26, %v1084_v27  ;;  %v3665_v24 = vld [vmem:[#allocation16 + $0x15c] ss:$28 sps:$4 sm:$0xff]  }
 0x332   :  { %3885 = vrsqrt.f32 %v1090_v28  ;;  %v3668_v26 = vld [vmem:[#allocation16 + $0x4dc] ss:$28 sps:$4 sm:$0xff]  }
 0x333   :  { %v1091_v32 = vadd.f32 1e-05, %v1086_v30  ;;  %v1093_v33 = vadd.f32 1e-05, %v1088_v31  ;;  %3887 = vrsqrt.f32 %v1092_v29  ;;  %v3663_v27 = vld [vmem:[#allocation16 + $0x158] ss:$28 sps:$4 sm:$0xff]  }
 0x334   :  { %v3666_v28 = vld [vmem:[#allocation16 + $0x4d8] ss:$28 sps:$4 sm:$0xff]   ;;  %v3671_v29 = vld [vmem:[#allocation16 + $0x124] ss:$28 sps:$4 sm:$0xff]  }
 0x335   :  { %3889 = vrsqrt.f32 %v1091_v32  ;;  %v3674_v30 = vld [vmem:[#allocation16 + $0x4a4] ss:$28 sps:$4 sm:$0xff]  }
 0x336   :  { %3891 = vrsqrt.f32 %v1093_v33  ;;  %v3669_v31 = vld [vmem:[#allocation16 + $0x120] ss:$28 sps:$4 sm:$0xff]   ;;  %v3677_v33 = vld [vmem:[#allocation16 + $0xec] ss:$28 sps:$4 sm:$0xff]  }
 0x337   :  { %v3672_v32 = vld [vmem:[#allocation16 + $0x4a0] ss:$28 sps:$4 sm:$0xff]  }
 0x33f   :  { %v3886_v34 = vpop.eup %3885 }
 0x340   :  { %v3888_v35 = vpop.eup %3887 }
 0x342   :  { %v3890_v36 = vpop.eup %3889 }
 0x343   :  { %v3892_v39 = vpop.eup %3891  ;;  %v1102_v41 = vcombine.low %v3886_v34, %v3890_v36  ;;  %v3680_v34 = vld [vmem:[#allocation16 + $0x46c] ss:$28 sps:$4 sm:$0xff]  }
 0x344   :  { %v1103_v42 = vcombine.low %v3888_v35, %v3892_v39  ;;  %v3675_v35 = vld [vmem:[#allocation16 + $0xe8] ss:$28 sps:$4 sm:$0xff]   ;;  %v3683_v39 = vld [vmem:[#allocation16 + $0xb4] ss:$28 sps:$4 sm:$0xff]  }
 0x345   :  { %v1110_v43 = vrot.slane %v1102_v41, %v4258_v25  ;;  %v3678_v36 = vld [vmem:[#allocation16 + $0x468] ss:$28 sps:$4 sm:$0xff]   ;;  %v3686_v41 = vld [vmem:[#allocation16 + $0x434] ss:$28 sps:$4 sm:$0xff]  }
 0x346   :  { %v1117_v45 = vrot.slane %v1103_v42, %v4258_v25  ;;  %v3681_v42 = vld [vmem:[#allocation16 + $0xb0] ss:$28 sps:$4 sm:$0xff]  }
 0x348   :  { %v1118_v46 = vcombine.low %v1110_v43, %v1117_v45  ;;  %v3684_v43 = vld [vmem:[#allocation16 + $0x430] ss:$28 sps:$4 sm:$0xff]   ;;  %v3689_v45 = vld [vmem:[#allocation16 + $0x7c] ss:$28 sps:$4 sm:$0xff]  }
 0x34a   :  { %v1125_v49 = vrot.slane %v1118_v46, %v4258_v25  ;;  %v3692_v46 = vld [vmem:[#allocation16 + $0x3fc] ss:$28 sps:$4 sm:$0xff]  }
 0x34c   :  { %v1127_v50 = vmul.f32 %v1125_v49, %v1089_v47  ;;  %v3687_v47 = vld [vmem:[#allocation16 + $0x78] ss:$28 sps:$4 sm:$0xff]  }
 0x34d   :  { %v3690_v49 = vld [vmem:[#allocation16 + $0x3f8] ss:$28 sps:$4 sm:$0xff]  }
 0x34e   :  { %v1141_v51 = vrot.slane %v1127_v50, %v4270_v60  ;;  %v1145_v52 = vrot.slane %v1127_v50, %v4276_v62  ;;  %v1133_v53 = vrot.slane %v1127_v50, %v4244_v38  ;;  %v1137_v54 = vrot.slane %v1127_v50, %v4247_v40  ;;  %v3695_v50 = vld [vmem:[#allocation16 + $0x44] ss:$28 sps:$4 sm:$0xff]  }
 0x350   :  { %v1152_v55 = vmul.f32 %v1141_v51, %v1047_v3  ;;  %v1153_v56 = vmul.f32 %v1145_v52, %v1048_v19  ;;  %v1150_v57 = vmul.f32 %v1133_v53, %v1045_v1  ;;  %v1151_v58 = vmul.f32 %v1137_v54, %v1046_v17 }
 0x351   :  { %v1187_v7 = vmul.f32 %v1145_v52, %v4294_v14  ;;  %v1185_v8 = vmul.f32 %v1137_v54, %v4292_v13  ;;  %v1184_v3 = vmul.f32 %v1133_v53, %v4282_v5  ;;  %v1186_v1 = vmul.f32 %v1141_v51, %v4284_v6  ;;  %v3657_v6 = vld [vmem:[#allocation16 + $0x190] ss:$28 sps:$4 sm:$0xff]   ;;  %v3698_v51 = vld [vmem:[#allocation16 + $0x3c4] ss:$28 sps:$4 sm:$0xff]  }
 0x352   :  { %v1159_v48 = vcombine.low %v1152_v55, %v1153_v56  ;;  %v1158_v44 = vcombine.low %v1150_v57, %v1151_v58  ;;  %v3693_v52 = vld [vmem:[#allocation16 + $0x40] ss:$28 sps:$4 sm:$0xff]   ;;  %v3701_v54 = vld [vmem:[#allocation16 + $0xc] ss:$28 sps:$4 sm:$0xff]   ;;  %v3707_v58 = vld [vmem:[#allocation16 + $0x354] ss:$28 sps:$4 sm:$0xff]  }
 0x353   :  { %v3696_v53 = vld [vmem:[#allocation16 + $0x3c0] ss:$28 sps:$4 sm:$0xff]   ;;  %v3704_v55 = vld [vmem:[#allocation16 + $0x38c] ss:$28 sps:$4 sm:$0xff]  }
 0x354   :  { %v1173_v59 = vrot.slane %v1159_v48, %v4258_v25  ;;  %v1166_v61 = vrot.slane %v1158_v44, %v4258_v25  ;;  %v3699_v56 = vld [vmem:[#allocation16 + $0x8] ss:$28 sps:$4 sm:$0xff]   ;;  %v3710_v48 = vld [vmem:[#allocation16 + $0x6d4] ss:$28 sps:$4 sm:$0xff]  }
 0x355   :  { %v3702_v57 = vld [vmem:[#allocation16 + $0x388] ss:$28 sps:$4 sm:$0xff]   ;;  %v3705_v44 = vld [vmem:[#allocation16 + $0x350] ss:$28 sps:$4 sm:$0xff]  }
 0x356   :  { %v1174_v63 = vcombine.low %v1166_v61, %v1173_v59  ;;  %v3708_v59 = vld [vmem:[#allocation16 + $0x6d0] ss:$28 sps:$4 sm:$0xff]   ;;  %v3713_v61 = vld [vmem:[#allocation16 + $0x31c] ss:$28 sps:$4 sm:$0xff]  }
 0x358   :  { %v1181_v2 = vrot.slane %v1174_v63, %v4258_v25  ;;  %v3716_v63 = vld [vmem:[#allocation16 + $0x69c] ss:$28 sps:$4 sm:$0xff]  }
 0x35a   :  { %v1183_v4 = vsub.f32 %v1128_v0, %v1181_v2  ;;  %v3711_v0 = vld [vmem:[#allocation16 + $0x318] ss:$28 sps:$4 sm:$0xff]  }
 0x35b   :  { %v3714_v2 = vld [vmem:[#allocation16 + $0x698] ss:$28 sps:$4 sm:$0xff]  }
 0x35c   :  { %v1196_v9 = vrot.slane %v1183_v4, %v4247_v40  ;;  %v1204_v10 = vrot.slane %v1183_v4, %v4276_v62  ;;  %v1192_v11 = vrot.slane %v1183_v4, %v4244_v38  ;;  %v1200_v12 = vrot.slane %v1183_v4, %v4270_v60  ;;  %v3719_v4 = vld [vmem:[#allocation16 + $0x2e4] ss:$28 sps:$4 sm:$0xff]  }
 0x35e   :  { %v1210_v15 = vadd.f32 %v1196_v9, %v1185_v8  ;;  %v1212_v16 = vadd.f32 %v1204_v10, %v1187_v7  ;;  %v1209_v25 = vadd.f32 %v1192_v11, %v1184_v3  ;;  %v1211_v17 = vadd.f32 %v1200_v12, %v1186_v1  ;;  %v3722_v7 = vld [vmem:[#allocation16 + $0x664] ss:$28 sps:$4 sm:$0xff]   ;;  %v3725_v1 = vld [vmem:[#allocation16 + $0x2ac] ss:$28 sps:$4 sm:$0xff]   ;;  %v3731_v12 = vld [vmem:[#allocation16 + $0x274] ss:$28 sps:$4 sm:$0xff]  }
 0x35f   :  { %v3717_v8 = vld [vmem:[#allocation16 + $0x2e0] ss:$28 sps:$4 sm:$0xff]   ;;  %v3728_v9 = vld [vmem:[#allocation16 + $0x62c] ss:$28 sps:$4 sm:$0xff]  }
 0x360   :  { %v1214_v18 = vmax.f32 %v1210_v15, 0.0  ;;  %v1216_v14 = vmax.f32 %v1212_v16, 0.0  ;;  %v1213_v19 = vmax.f32 %v1209_v25, 0.0  ;;  %v1215_v13 = vmax.f32 %v1211_v17, 0.0  ;;  %v3720_v3 = vld [vmem:[#allocation16 + $0x660] ss:$28 sps:$4 sm:$0xff]  }
 0x361   :  { %v3723_v10 = vld [vmem:[#allocation16 + $0x2a8] ss:$28 sps:$4 sm:$0xff]   ;;  %v3734_v15 = vld [vmem:[#allocation16 + $0x5f4] ss:$28 sps:$4 sm:$0xff]   ;;  %v3737_v17 = vld [vmem:[#allocation16 + $0x23c] ss:$28 sps:$4 sm:$0xff]  }
 0x362   :  { %v4327_v20 = vpack.c.bf16 %v1214_v18, %v1214_v18  ;;  %v4329_v5 = vpack.c.bf16 %v1216_v14, %v1216_v14  ;;  %v4331_v22 = vpack.c.bf16 %v1213_v19, %v1213_v19  ;;  %v4333_v23 = vpack.c.bf16 %v1215_v13, %v1215_v13  ;;  %v3726_v11 = vld [vmem:[#allocation16 + $0x628] ss:$28 sps:$4 sm:$0xff]   ;;  %v3729_v16 = vld [vmem:[#allocation16 + $0x270] ss:$28 sps:$4 sm:$0xff]   ;;  %v3740_v18 = vld [vmem:[#allocation16 + $0x5bc] ss:$28 sps:$4 sm:$0xff]  }
 0x363   :  { %v3732_v25 = vld [vmem:[#allocation16 + $0x5f0] ss:$28 sps:$4 sm:$0xff]   ;;  %v3735_v14 = vld [vmem:[#allocation16 + $0x238] ss:$28 sps:$4 sm:$0xff]   ;;  %v3743_v13 = vld [vmem:[#allocation16 + $0x204] ss:$28 sps:$4 sm:$0xff]  }
 0x364   :  { %2698 = vmatprep.mubr.bf16.mxu0 %v4327_v20  ;;  %2739 = vmatprep.mubr.bf16.mxu1 %v4329_v5  ;;  %v3738_v19 = vld [vmem:[#allocation16 + $0x5b8] ss:$28 sps:$4 sm:$0xff]  }
 0x365   :  { %2699 = vmatmul.mubr.bf16.vlgmr.msra.gmra.mxu0 %v4331_v22  ;;  %2740 = vmatmul.mubr.bf16.vlgmr.msra.gmra.mxu1 %v4333_v23 }
 0x366   :  { %2749 = vmatpush1.bf16.msra.mxu0 %v3657_v6  ;;  %2790 = vmatpush1.bf16.msra.mxu1 %v3660_v21  ;;  %v3746_v6 = vld [vmem:[#allocation16 + $0x584] ss:$28 sps:$4 sm:$0xff]  }
 0x367   :  { %2780 = vmatprep.mubr.bf16.mxu0 %v4327_v20  ;;  %2821 = vmatprep.mubr.bf16.mxu1 %v4329_v5  ;;  %v3741_v21 = vld [vmem:[#allocation16 + $0x200] ss:$28 sps:$4 sm:$0xff]  }
 0x368   :  { %2750 = vmatprep.subr.bf16.mxu0 %v3665_v24  ;;  %2791 = vmatprep.subr.bf16.mxu1 %v3668_v26  ;;  %v3744_v24 = vld [vmem:[#allocation16 + $0x580] ss:$28 sps:$4 sm:$0xff]   ;;  %v3749_v26 = vld [vmem:[#allocation16 + $0x1cc] ss:$28 sps:$4 sm:$0xff]  }
 0x36a   :  { %2751 = vmatpush1.bf16.msra.mxu0 %v3663_v27  ;;  %2792 = vmatpush1.bf16.msra.mxu1 %v3666_v28  ;;  %v3752_v27 = vld [vmem:[#allocation16 + $0x54c] ss:$28 sps:$4 sm:$0xff]  }
 0x36b   :  { %2752 = vmatprep.subr.bf16.mxu0 %v3671_v29  ;;  %2793 = vmatprep.subr.bf16.mxu1 %v3674_v30  ;;  %v3747_v28 = vld [vmem:[#allocation16 + $0x1c8] ss:$28 sps:$4 sm:$0xff]   ;;  %v3755_v30 = vld [vmem:[#allocation16 + $0x19c] ss:$28 sps:$4 sm:$0xff]  }
 0x36c   :  { %v3750_v29 = vld [vmem:[#allocation16 + $0x548] ss:$28 sps:$4 sm:$0xff]  }
 0x36e   :  { %2753 = vmatpush1.bf16.msra.mxu0 %v3669_v31  ;;  %2794 = vmatpush1.bf16.msra.mxu1 %v3672_v32  ;;  %v3758_v31 = vld [vmem:[#allocation16 + $0x51c] ss:$28 sps:$4 sm:$0xff]  }
 0x36f   :  { %2754 = vmatprep.subr.bf16.mxu0 %v3677_v33  ;;  %2795 = vmatprep.subr.bf16.mxu1 %v3680_v34  ;;  %v3753_v32 = vld [vmem:[#allocation16 + $0x198] ss:$28 sps:$4 sm:$0xff]   ;;  %v3761_v34 = vld [vmem:[#allocation16 + $0x164] ss:$28 sps:$4 sm:$0xff]  }
 0x370   :  { %v3756_v33 = vld [vmem:[#allocation16 + $0x518] ss:$28 sps:$4 sm:$0xff]  }
 0x372   :  { %2755 = vmatpush1.bf16.msra.mxu0 %v3675_v35  ;;  %2796 = vmatpush1.bf16.msra.mxu1 %v3678_v36  ;;  %v3764_v35 = vld [vmem:[#allocation16 + $0x4e4] ss:$28 sps:$4 sm:$0xff]  }
 0x373   :  { %2756 = vmatprep.subr.bf16.mxu0 %v3683_v39  ;;  %2797 = vmatprep.subr.bf16.mxu1 %v3686_v41  ;;  %v3759_v36 = vld [vmem:[#allocation16 + $0x160] ss:$28 sps:$4 sm:$0xff]   ;;  %v3767_v41 = vld [vmem:[#allocation16 + $0x12c] ss:$28 sps:$4 sm:$0xff]  }
 0x374   :  { %v3762_v39 = vld [vmem:[#allocation16 + $0x4e0] ss:$28 sps:$4 sm:$0xff]  }
 0x376   :  { %2757 = vmatpush1.bf16.msra.mxu0 %v3681_v42  ;;  %2798 = vmatpush1.bf16.msra.mxu1 %v3684_v43  ;;  %v3770_v42 = vld [vmem:[#allocation16 + $0x4ac] ss:$28 sps:$4 sm:$0xff]  }
 0x377   :  { %2758 = vmatprep.subr.bf16.mxu0 %v3689_v45  ;;  %2799 = vmatprep.subr.bf16.mxu1 %v3692_v46  ;;  %v3765_v43 = vld [vmem:[#allocation16 + $0x128] ss:$28 sps:$4 sm:$0xff]   ;;  %v3773_v46 = vld [vmem:[#allocation16 + $0xf4] ss:$28 sps:$4 sm:$0xff]  }
 0x378   :  { %v3768_v45 = vld [vmem:[#allocation16 + $0x4a8] ss:$28 sps:$4 sm:$0xff]  }
 0x37a   :  { %2759 = vmatpush1.bf16.msra.mxu0 %v3687_v47  ;;  %2800 = vmatpush1.bf16.msra.mxu1 %v3690_v49  ;;  %v3776_v47 = vld [vmem:[#allocation16 + $0x474] ss:$28 sps:$4 sm:$0xff]  }
 0x37b   :  { %2760 = vmatprep.subr.bf16.mxu0 %v3695_v50  ;;  %2801 = vmatprep.subr.bf16.mxu1 %v3698_v51  ;;  %v3771_v49 = vld [vmem:[#allocation16 + $0xf0] ss:$28 sps:$4 sm:$0xff]   ;;  %v3779_v51 = vld [vmem:[#allocation16 + $0xbc] ss:$28 sps:$4 sm:$0xff]  }
 0x37c   :  { %v3774_v50 = vld [vmem:[#allocation16 + $0x470] ss:$28 sps:$4 sm:$0xff]  }
 0x37e   :  { %2761 = vmatpush1.bf16.msra.mxu0 %v3693_v52  ;;  %2802 = vmatpush1.bf16.msra.mxu1 %v3696_v53  ;;  %v3782_v52 = vld [vmem:[#allocation16 + $0x43c] ss:$28 sps:$4 sm:$0xff]  }
 0x37f   :  { %2762 = vmatprep.subr.bf16.mxu0 %v3701_v54  ;;  %2803 = vmatprep.subr.bf16.mxu1 %v3704_v55  ;;  %v3777_v53 = vld [vmem:[#allocation16 + $0xb8] ss:$28 sps:$4 sm:$0xff]   ;;  %v3785_v55 = vld [vmem:[#allocation16 + $0x84] ss:$28 sps:$4 sm:$0xff]  }
 0x380   :  { %v3780_v54 = vld [vmem:[#allocation16 + $0x438] ss:$28 sps:$4 sm:$0xff]  }
 0x382   :  { %2763 = vmatpush1.bf16.msra.mxu0 %v3699_v56  ;;  %2804 = vmatpush1.bf16.msra.mxu1 %v3702_v57  ;;  %v3788_v56 = vld [vmem:[#allocation16 + $0x404] ss:$28 sps:$4 sm:$0xff]  }
 0x383   :  { %2764 = vmatprep.subr.bf16.mxu0 %v3707_v58  ;;  %2805 = vmatprep.subr.bf16.mxu1 %v3710_v48  ;;  %v3783_v57 = vld [vmem:[#allocation16 + $0x80] ss:$28 sps:$4 sm:$0xff]   ;;  %v3791_v48 = vld [vmem:[#allocation16 + $0x4c] ss:$28 sps:$4 sm:$0xff]  }
 0x384   :  { %v3786_v58 = vld [vmem:[#allocation16 + $0x400] ss:$28 sps:$4 sm:$0xff]  }
 0x386   :  { %2765 = vmatpush2.bf16.msra.mxu0 %v3705_v44  ;;  %2806 = vmatpush2.bf16.msra.mxu1 %v3708_v59  ;;  %v3794_v44 = vld [vmem:[#allocation16 + $0x3cc] ss:$28 sps:$4 sm:$0xff]  }
 0x387   :  { %2766 = vmatprep.subr.bf16.mxu0 %v3713_v61  ;;  %2807 = vmatprep.subr.bf16.mxu1 %v3716_v63  ;;  %v3789_v59 = vld [vmem:[#allocation16 + $0x48] ss:$28 sps:$4 sm:$0xff]   ;;  %v3797_v63 = vld [vmem:[#allocation16 + $0x14] ss:$28 sps:$4 sm:$0xff]  }
 0x388   :  { %v3792_v61 = vld [vmem:[#allocation16 + $0x3c8] ss:$28 sps:$4 sm:$0xff]  }
 0x38a   :  { %2767 = vmatpush2.bf16.msra.mxu0 %v3711_v0  ;;  %2808 = vmatpush2.bf16.msra.mxu1 %v3714_v2  ;;  %v3800_v0 = vld [vmem:[#allocation16 + $0x394] ss:$28 sps:$4 sm:$0xff]  }
 0x38b   :  { %2768 = vmatprep.subr.bf16.mxu0 %v3719_v4  ;;  %2809 = vmatprep.subr.bf16.mxu1 %v3722_v7  ;;  %v3795_v2 = vld [vmem:[#allocation16 + $0x10] ss:$28 sps:$4 sm:$0xff]   ;;  %v3803_v7 = vld [vmem:[#allocation16 + $0x35c] ss:$28 sps:$4 sm:$0xff]  }
 0x38c   :  { %v3798_v4 = vld [vmem:[#allocation16 + $0x390] ss:$28 sps:$4 sm:$0xff]  }
 0x38e   :  { %2769 = vmatpush2.bf16.msra.mxu0 %v3717_v8  ;;  %2810 = vmatpush2.bf16.msra.mxu1 %v3720_v3  ;;  %v3806_v8 = vld [vmem:[#allocation16 + $0x6dc] ss:$28 sps:$4 sm:$0xff]  }
 0x38f   :  { %2770 = vmatprep.subr.bf16.mxu0 %v3725_v1  ;;  %2811 = vmatprep.subr.bf16.mxu1 %v3728_v9  ;;  %v3801_v3 = vld [vmem:[#allocation16 + $0x358] ss:$28 sps:$4 sm:$0xff]   ;;  %v3809_v9 = vld [vmem:[#allocation16 + $0x324] ss:$28 sps:$4 sm:$0xff]  }
 0x390   :  { %v3804_v1 = vld [vmem:[#allocation16 + $0x6d8] ss:$28 sps:$4 sm:$0xff]  }
 0x392   :  { %2771 = vmatpush2.bf16.msra.mxu0 %v3723_v10  ;;  %2812 = vmatpush2.bf16.msra.mxu1 %v3726_v11  ;;  %v3812_v10 = vld [vmem:[#allocation16 + $0x6a4] ss:$28 sps:$4 sm:$0xff]  }
 0x393   :  { %2772 = vmatprep.subr.bf16.mxu0 %v3731_v12  ;;  %2813 = vmatprep.subr.bf16.mxu1 %v3734_v15  ;;  %v3807_v11 = vld [vmem:[#allocation16 + $0x320] ss:$28 sps:$4 sm:$0xff]   ;;  %v3815_v15 = vld [vmem:[#allocation16 + $0x2ec] ss:$28 sps:$4 sm:$0xff]  }
 0x394   :  { %v3810_v12 = vld [vmem:[#allocation16 + $0x6a0] ss:$28 sps:$4 sm:$0xff]  }
 0x396   :  { %2773 = vmatpush2.bf16.msra.mxu0 %v3729_v16  ;;  %2814 = vmatpush2.bf16.msra.mxu1 %v3732_v25  ;;  %v3818_v16 = vld [vmem:[#allocation16 + $0x66c] ss:$28 sps:$4 sm:$0xff]  }
 0x397   :  { %2774 = vmatprep.subr.bf16.mxu0 %v3737_v17  ;;  %2815 = vmatprep.subr.bf16.mxu1 %v3740_v18  ;;  %v3813_v25 = vld [vmem:[#allocation16 + $0x2e8] ss:$28 sps:$4 sm:$0xff]   ;;  %v3821_v18 = vld [vmem:[#allocation16 + $0x2b4] ss:$28 sps:$4 sm:$0xff]  }
 0x398   :  { %v3816_v17 = vld [vmem:[#allocation16 + $0x668] ss:$28 sps:$4 sm:$0xff]  }
 0x39a   :  { %2775 = vmatpush2.bf16.msra.mxu0 %v3735_v14  ;;  %2816 = vmatpush2.bf16.msra.mxu1 %v3738_v19  ;;  %v3824_v14 = vld [vmem:[#allocation16 + $0x634] ss:$28 sps:$4 sm:$0xff]  }
 0x39b   :  { %2776 = vmatprep.subr.bf16.mxu0 %v3743_v13  ;;  %2817 = vmatprep.subr.bf16.mxu1 %v3746_v6  ;;  %v3819_v19 = vld [vmem:[#allocation16 + $0x2b0] ss:$28 sps:$4 sm:$0xff]   ;;  %v3827_v6 = vld [vmem:[#allocation16 + $0x27c] ss:$28 sps:$4 sm:$0xff]  }
 0x39c   :  { %v3822_v13 = vld [vmem:[#allocation16 + $0x630] ss:$28 sps:$4 sm:$0xff]  }
 0x39e   :  { %2777 = vmatpush2.bf16.msra.mxu0 %v3741_v21  ;;  %2818 = vmatpush2.bf16.msra.mxu1 %v3744_v24  ;;  %v3830_v21 = vld [vmem:[#allocation16 + $0x5fc] ss:$28 sps:$4 sm:$0xff]  }
 0x39f   :  { %2778 = vmatprep.subr.bf16.mxu0 %v3749_v26  ;;  %2819 = vmatprep.subr.bf16.mxu1 %v3752_v27  ;;  %v3825_v24 = vld [vmem:[#allocation16 + $0x278] ss:$28 sps:$4 sm:$0xff]   ;;  %v3833_v27 = vld [vmem:[#allocation16 + $0x244] ss:$28 sps:$4 sm:$0xff]  }
 0x3a0   :  { %v3828_v26 = vld [vmem:[#allocation16 + $0x5f8] ss:$28 sps:$4 sm:$0xff]  }
 0x3a2   :  { %2779 = vmatpush2.bf16.msra.mxu0 %v3747_v28  ;;  %2820 = vmatpush2.bf16.msra.mxu1 %v3750_v29  ;;  %v3836_v28 = vld [vmem:[#allocation16 + $0x5c4] ss:$28 sps:$4 sm:$0xff]  }
 0x3a3   :  { %2830 = vmatprep.subr.bf16.mxu0 %v3755_v30  ;;  %2871 = vmatprep.subr.bf16.mxu1 %v3758_v31  ;;  %v3831_v29 = vld [vmem:[#allocation16 + $0x240] ss:$28 sps:$4 sm:$0xff]   ;;  %v3839_v31 = vld [vmem:[#allocation16 + $0x20c] ss:$28 sps:$4 sm:$0xff]  }
 0x3a4   :  { %v3834_v30 = vld [vmem:[#allocation16 + $0x5c0] ss:$28 sps:$4 sm:$0xff]  }
 0x3a5   :  { %2781 = vmatmul.mubr.bf16.vlgmr.msra.gmra.mxu0 %v4331_v22  ;;  %2822 = vmatmul.mubr.bf16.vlgmr.msra.gmra.mxu1 %v4333_v23 }
 0x3a6   :  { %2831 = vmatpush1.bf16.msra.mxu0 %v3753_v32  ;;  %2862 = vmatprep.mubr.bf16.mxu0 %v4327_v20  ;;  %v3842_v32 = vld [vmem:[#allocation16 + $0x58c] ss:$28 sps:$4 sm:$0xff]  }
 0x3a7   :  { %2872 = vmatpush1.bf16.msra.mxu1 %v3756_v33  ;;  %2903 = vmatprep.mubr.bf16.mxu1 %v4329_v5  ;;  %v3837_v33 = vld [vmem:[#allocation16 + $0x208] ss:$28 sps:$4 sm:$0xff]  }
 0x3a8   :  { %2832 = vmatprep.subr.bf16.mxu0 %v3761_v34  ;;  %2873 = vmatprep.subr.bf16.mxu1 %v3764_v35  ;;  %v3840_v34 = vld [vmem:[#allocation16 + $0x588] ss:$28 sps:$4 sm:$0xff]   ;;  %v3845_v35 = vld [vmem:[#allocation16 + $0x1d4] ss:$28 sps:$4 sm:$0xff]  }
 0x3aa   :  { %2833 = vmatpush1.bf16.msra.mxu0 %v3759_v36  ;;  %v3848_v36 = vld [vmem:[#allocation16 + $0x554] ss:$28 sps:$4 sm:$0xff]  }
 0x3ab   :  { %2874 = vmatpush1.bf16.msra.mxu1 %v3762_v39  ;;  %2834 = vmatprep.subr.bf16.mxu0 %v3767_v41  ;;  %v3843_v39 = vld [vmem:[#allocation16 + $0x1d0] ss:$28 sps:$4 sm:$0xff]  }
 0x3ac   :  { %2875 = vmatprep.subr.bf16.mxu1 %v3770_v42  ;;  %v3846_v41 = vld [vmem:[#allocation16 + $0x550] ss:$28 sps:$4 sm:$0xff]   ;;  %v3849_v42 = vld [vmem:[#allocation16 + $0x360] ss:$28 sps:$4 sm:$0xff]  }
 0x3ae   :  { %2835 = vmatpush1.bf16.msra.mxu0 %v3765_v43  ;;  %v3850_v43 = vld [vmem:[#allocation16 + $0x6e0] ss:$28 sps:$4 sm:$0xff]  }
 0x3af   :  { %2876 = vmatpush1.bf16.msra.mxu1 %v3768_v45  ;;  %2836 = vmatprep.subr.bf16.mxu0 %v3773_v46  ;;  %v3851_v45 = vld [vmem:[#allocation16 + $0x1a0] ss:$28 sps:$4 sm:$0xff]  }
 0x3b0   :  { %2877 = vmatprep.subr.bf16.mxu1 %v3776_v47  ;;  %v3852_v46 = vld [vmem:[#allocation16 + $0x520] ss:$28 sps:$4 sm:$0xff]   ;;  %v3853_v47 = vld [vmem:[#allocation16 + $0x328] ss:$28 sps:$4 sm:$0xff]  }
 0x3b2   :  { %2837 = vmatpush1.bf16.msra.mxu0 %v3771_v49  ;;  %v3854_v49 = vld [vmem:[#allocation16 + $0x6a8] ss:$28 sps:$4 sm:$0xff]  }
 0x3b3   :  { %2878 = vmatpush1.bf16.msra.mxu1 %v3774_v50  ;;  %2838 = vmatprep.subr.bf16.mxu0 %v3779_v51  ;;  %v3855_v50 = vld [vmem:[#allocation16 + $0x168] ss:$28 sps:$4 sm:$0xff]  }
 0x3b4   :  { %2879 = vmatprep.subr.bf16.mxu1 %v3782_v52  ;;  %v3856_v51 = vld [vmem:[#allocation16 + $0x4e8] ss:$28 sps:$4 sm:$0xff]   ;;  %v3857_v52 = vld [vmem:[#allocation16 + $0x2f0] ss:$28 sps:$4 sm:$0xff]  }
 0x3b6   :  { %2839 = vmatpush1.bf16.msra.mxu0 %v3777_v53  ;;  %v3858_v53 = vld [vmem:[#allocation16 + $0x670] ss:$28 sps:$4 sm:$0xff]  }
 0x3b7   :  { %2880 = vmatpush1.bf16.msra.mxu1 %v3780_v54  ;;  %2840 = vmatprep.subr.bf16.mxu0 %v3785_v55  ;;  %v3859_v54 = vld [vmem:[#allocation16 + $0x130] ss:$28 sps:$4 sm:$0xff]  }
 0x3b8   :  { %2881 = vmatprep.subr.bf16.mxu1 %v3788_v56  ;;  %v3860_v55 = vld [vmem:[#allocation16 + $0x4b0] ss:$28 sps:$4 sm:$0xff]   ;;  %v3861_v56 = vld [vmem:[#allocation16 + $0x2b8] ss:$28 sps:$4 sm:$0xff]  }
 0x3ba   :  { %2841 = vmatpush1.bf16.msra.mxu0 %v3783_v57  ;;  %v3862_v57 = vld [vmem:[#allocation16 + $0x638] ss:$28 sps:$4 sm:$0xff]  }
 0x3bb   :  { %2882 = vmatpush1.bf16.msra.mxu1 %v3786_v58  ;;  %2842 = vmatprep.subr.bf16.mxu0 %v3791_v48  ;;  %v3863_v58 = vld [vmem:[#allocation16 + $0xf8] ss:$28 sps:$4 sm:$0xff]   ;;  %v3865_v48 = vld [vmem:[#allocation16 + $0x280] ss:$28 sps:$4 sm:$0xff]  }
 0x3bc   :  { %2883 = vmatprep.subr.bf16.mxu1 %v3794_v44  ;;  %v3866_v44 = vld [vmem:[#allocation16 + $0x600] ss:$28 sps:$4 sm:$0xff]  }
 0x3be   :  { %2843 = vmatpush1.bf16.msra.mxu0 %v3789_v59  ;;  %v3868_v59 = vld [vmem:[#allocation16 + $0x440] ss:$28 sps:$4 sm:$0xff]  }
 0x3bf   :  { %2884 = vmatpush1.bf16.msra.mxu1 %v3792_v61  ;;  %2844 = vmatprep.subr.bf16.mxu0 %v3797_v63  ;;  %v3869_v61 = vld [vmem:[#allocation16 + $0x248] ss:$28 sps:$4 sm:$0xff]  }
 0x3c0   :  { %2885 = vmatprep.subr.bf16.mxu1 %v3800_v0  ;;  %v3870_v63 = vld [vmem:[#allocation16 + $0x5c8] ss:$28 sps:$4 sm:$0xff]  }
 0x3c1   :  { %v3871_v0 = vld [vmem:[#allocation16 + $0x88] ss:$28 sps:$4 sm:$0xff]  }
 0x3c2   :  { %2845 = vmatpush1.bf16.msra.mxu0 %v3795_v2  ;;  %v3872_v2 = vld [vmem:[#allocation16 + $0x408] ss:$28 sps:$4 sm:$0xff]  }
 0x3c3   :  { %2886 = vmatpush1.bf16.msra.mxu1 %v3798_v4  ;;  %2846 = vmatprep.subr.bf16.mxu0 %v3803_v7  ;;  %v3873_v4 = vld [vmem:[#allocation16 + $0x210] ss:$28 sps:$4 sm:$0xff]  }
 0x3c4   :  { %2887 = vmatprep.subr.bf16.mxu1 %v3806_v8  ;;  %v3874_v7 = vld [vmem:[#allocation16 + $0x590] ss:$28 sps:$4 sm:$0xff]  }
 0x3c5   :  { %v3875_v8 = vld [vmem:[#allocation16 + $0x50] ss:$28 sps:$4 sm:$0xff]  }
 0x3c6   :  { %2847 = vmatpush2.bf16.msra.mxu0 %v3801_v3  ;;  %v3876_v3 = vld [vmem:[#allocation16 + $0x3d0] ss:$28 sps:$4 sm:$0xff]  }
 0x3c7   :  { %2888 = vmatpush2.bf16.msra.mxu1 %v3804_v1  ;;  %2848 = vmatprep.subr.bf16.mxu0 %v3809_v9  ;;  %v3877_v1 = vld [vmem:[#allocation16 + $0x1d8] ss:$28 sps:$4 sm:$0xff]  }
 0x3c8   :  { %2889 = vmatprep.subr.bf16.mxu1 %v3812_v10  ;;  %v3878_v9 = vld [vmem:[#allocation16 + $0x558] ss:$28 sps:$4 sm:$0xff]  }
 0x3c9   :  { %v3879_v10 = vld [vmem:[#allocation16 + $0x18] ss:$28 sps:$4 sm:$0xff]  }
 0x3ca   :  { %2849 = vmatpush2.bf16.msra.mxu0 %v3807_v11  ;;  %v3880_v11 = vld [vmem:[#allocation16 + $0x398] ss:$28 sps:$4 sm:$0xff]  }
 0x3cb   :  { %2890 = vmatpush2.bf16.msra.mxu1 %v3810_v12  ;;  %2850 = vmatprep.subr.bf16.mxu0 %v3815_v15  ;;  %v4354_v12 = vld [vmem:[%s4385_s12] sm:$0xff]  ;;  %s4140_s12 = smov [#allocation17]  }
 0x3cc   :  { %2891 = vmatprep.subr.bf16.mxu1 %v3818_v16  ;;  %v1482_v15 = vrot.slane %v4354_v12, %v4244_v38  ;;  %v1486_v16 = vrot.slane %v4354_v12, %v4247_v40  ;;  %v1490_v40 = vrot.slane %v4354_v12, %v4270_v60  ;;  %s3012_s19 = sshll.u32 %s4140_s12, 4  ;;  %s3013_s19 = int_to_ptr.vmem [resolvable:$true] %s3012_s19 }
 0x3cd   :  { %s4087_s20 = scalar_lea.vmem %s3013_s19, 896  ;;  %p4092_p4 = scmp.lt.s32.totalorder %s3013_s19, %s3013_s19 }
 0x3ce   :  { %2851 = vmatpush2.bf16.msra.mxu0 %v3813_v25  ;;  %p4088_p3 = scmp.ne.s32.totalorder %s3013_s19, %s4087_s20  ;;  %p4093_p5 = scmp.lt.s32.totalorder %s4087_s20, %s4087_s20 }
 0x3cf   :  { %2892 = vmatpush2.bf16.msra.mxu1 %v3816_v17  ;;  %2852 = vmatprep.subr.bf16.mxu0 %v3821_v18 }
 0x3d0   :  { %2893 = vmatprep.subr.bf16.mxu1 %v3824_v14  ;;  %p4094_p6 = por %p4093_p5, %p4092_p4 }
 0x3d2   :  { %2853 = vmatpush2.bf16.msra.mxu0 %v3819_v19  ;;  %p4095_p7 = pnand %p4094_p6, %p4088_p3 }
 0x3d3   :  { %2894 = vmatpush2.bf16.msra.mxu1 %v3822_v13  ;;  %2854 = vmatprep.subr.bf16.mxu0 %v3827_v6 }
 0x3d4   :  { %2895 = vmatprep.subr.bf16.mxu1 %v3830_v21 }
 0x3d6   :  { %2855 = vmatpush2.bf16.msra.mxu0 %v3825_v24 }
 0x3d7   :  { %2896 = vmatpush2.bf16.msra.mxu1 %v3828_v26  ;;  %2856 = vmatprep.subr.bf16.mxu0 %v3833_v27 }
 0x3d8   :  { %2897 = vmatprep.subr.bf16.mxu1 %v3836_v28  ;;  %v1494_v28 = vrot.slane %v4354_v12, %v4276_v62  ;;  %v1497_v62 = vsub.s32 4, %v4241_v37 }
 0x3da   :  { %2857 = vmatpush2.bf16.msra.mxu0 %v3831_v29 }
 0x3db   :  { %2898 = vmatpush2.bf16.msra.mxu1 %v3834_v30  ;;  %2858 = vmatprep.subr.bf16.mxu0 %v3839_v31 }
 0x3dc   :  { %2899 = vmatprep.subr.bf16.mxu1 %v3842_v32 }
 0x3de   :  { %2859 = vmatpush2.bf16.msra.mxu0 %v3837_v33 }
 0x3df   :  { %2900 = vmatpush2.bf16.msra.mxu1 %v3840_v34  ;;  %2860 = vmatprep.subr.bf16.mxu0 %v3845_v35 }
 0x3e0   :  { %2901 = vmatprep.subr.bf16.mxu1 %v3848_v36 }
 0x3e2   :  { %2861 = vmatpush2.bf16.msra.mxu0 %v3843_v39 }
 0x3e3   :  { %2902 = vmatpush2.bf16.msra.mxu1 %v3846_v41  ;;  %3347 = vmatprep.subr.bf16.mxu0 %v3849_v42 }
 0x3e4   :  { %3369 = vmatprep.subr.bf16.mxu1 %v3850_v43 }
 0x3e5   :  { %2863 = vmatmul.mubr.bf16.vlgmr.msra.gmra.mxu0 %v4331_v22 }
 0x3e6   :  { %2904 = vmatmul.mubr.bf16.vlgmr.msra.gmra.mxu1 %v4333_v23  ;;  %3348 = vmatpush3.bf16.msra.mxu0 %v3851_v45 }
 0x3e7   :  { %2944 = vmatprep.mubr.bf16.mxu0 %v4327_v20  ;;  %3370 = vmatpush3.bf16.msra.mxu1 %v3852_v46  ;;  %v3864_v20 = vld [vmem:[#allocation16 + $0x478] ss:$28 sps:$4 sm:$0xff]   ;;  %v1501_v46 = vsub.s32 5, %v4241_v37 }
 0x3e8   :  { %2984 = vmatprep.mubr.bf16.mxu1 %v4329_v5  ;;  %3349 = vmatprep.subr.bf16.mxu0 %v3853_v47  ;;  %v3867_v5 = vld [vmem:[#allocation16 + $0xc0] ss:$28 sps:$4 sm:$0xff]   ;;  %v1498_v47 = vrot.slane %v4354_v12, %v1497_v62 }
 0x3e9   :  { %3371 = vmatprep.subr.bf16.mxu1 %v3854_v49  ;;  %v1502_v49 = vrot.slane %v4354_v12, %v1501_v46 }
 0x3ea   :  { %3350 = vmatpush3.bf16.msra.mxu0 %v3855_v50 }
 0x3eb   :  { %3372 = vmatpush3.bf16.msra.mxu1 %v3856_v51  ;;  %3351 = vmatprep.subr.bf16.mxu0 %v3857_v52 }
 0x3ec   :  { %3373 = vmatprep.subr.bf16.mxu1 %v3858_v53 }
 0x3ee   :  { %3352 = vmatpush3.bf16.msra.mxu0 %v3859_v54 }
 0x3ef   :  { %3374 = vmatpush3.bf16.msra.mxu1 %v3860_v55  ;;  %3353 = vmatprep.subr.bf16.mxu0 %v3861_v56 }
 0x3f0   :  { %3375 = vmatprep.subr.bf16.mxu1 %v3862_v57 }
 0x3f2   :  { %3354 = vmatpush3.bf16.msra.mxu0 %v3863_v58 }
 0x3f3   :  { %3376 = vmatpush3.bf16.msra.mxu1 %v3864_v20  ;;  %3355 = vmatprep.subr.bf16.mxu0 %v3865_v48 }
 0x3f4   :  { %3377 = vmatprep.subr.bf16.mxu1 %v3866_v44 }
 0x3f6   :  { %3356 = vmatpush3.bf16.msra.mxu0 %v3867_v5 }
 0x3f7   :  { %3378 = vmatpush3.bf16.msra.mxu1 %v3868_v59  ;;  %3357 = vmatprep.subr.bf16.mxu0 %v3869_v61  ;;  %v1505_v61 = vsub.s32 6, %v4241_v37 }
 0x3f8   :  { %3379 = vmatprep.subr.bf16.mxu1 %v3870_v63 }
 0x3fa   :  { %3358 = vmatpush3.bf16.msra.mxu0 %v3871_v0 }
 0x3fb   :  { %3380 = vmatpush3.bf16.msra.mxu1 %v3872_v2  ;;  %3359 = vmatprep.subr.bf16.mxu0 %v3873_v4  ;;  %v1506_v2 = vrot.slane %v4354_v12, %v1505_v61 }
 0x3fc   :  { %3381 = vmatprep.subr.bf16.mxu1 %v3874_v7 }
 0x3fe   :  { %3360 = vmatpush3.bf16.msra.mxu0 %v3875_v8 }
 0x3ff   :  { %3382 = vmatpush3.bf16.msra.mxu1 %v3876_v3  ;;  %3361 = vmatprep.subr.bf16.mxu0 %v3877_v1 }
 0x400   :  { %3383 = vmatprep.subr.bf16.mxu1 %v3878_v9 }
 0x402   :  { %3362 = vmatpush3.bf16.msra.mxu0 %v3879_v10 }
 0x403   :  { %3384 = vmatpush3.bf16.msra.mxu1 %v3880_v11 }
 0x405   :  { %2945 = vmatmul.mubr.bf16.vlgmr.msra.gmra.mxu0 %v4331_v22 }
 0x406   :  { %2985 = vmatmul.mubr.bf16.vlgmr.msra.gmra.mxu1 %v4333_v23 }
 0x425   :  { %v2700_v25 = vpop.f32.mrf.mxu0  ;;  %v2741_v17 = vpop.f32.mrf.mxu1 }
 0x426   :  { %v2701_v18 = vadd.f32 %v2700_v25, %v1482_v15 }
 0x427   :  { %v2702_v14 = vpop.f32.mrf.mxu0  ;;  %v2743_v19 = vpop.f32.mrf.mxu1 }
 0x428   :  { %v2742_v13 = vadd.f32 %v2741_v17, %v2701_v18  ;;  %v2703_v22 = vadd.f32 %v2702_v14, %v1486_v16 }
 0x429   :  { %v2704_v6 = vpop.f32.mrf.mxu0  ;;  %v2745_v23 = vpop.f32.mrf.mxu1 }
 0x42a   :  { %3893 = vtanh.f32 %v2742_v13  ;;  %v2744_v21 = vadd.f32 %v2743_v19, %v2703_v22 }
 0x42b   :  { %v2705_v24 = vpop.f32.mrf.mxu0  ;;  %v2746_v26 = vpop.f32.mrf.mxu1 }
 0x42c   :  { %3895 = vtanh.f32 %v2744_v21 }
 0x437   :  { %v3894_v27 = vpop.eup %3893 }
 0x438   :  { %2999 = vst [vmem:[#allocation17] sm:$0xff] %v3894_v27 }
 0x439   :  { %v3896_v38 = vpop.eup %3895 }
 0x43a   :  { %3000 = vst [vmem:[#allocation17 + $0x8] sm:$0xff] %v3896_v38 }
 0x465   :  { %v2782_v29 = vpop.f32.mrf.mxu0  ;;  %v2823_v30 = vpop.f32.mrf.mxu1 }
 0x466   :  { %v2783_v31 = vadd.f32 %v2782_v29, %v1490_v40 }
 0x467   :  { %v2784_v32 = vpop.f32.mrf.mxu0  ;;  %v2825_v33 = vpop.f32.mrf.mxu1 }
 0x468   :  { %v2824_v34 = vadd.f32 %v2823_v30, %v2783_v31  ;;  %v2785_v35 = vadd.f32 %v2784_v32, %v1494_v28 }
 0x469   :  { %v2786_v36 = vpop.f32.mrf.mxu0  ;;  %v2827_v39 = vpop.f32.mrf.mxu1 }
 0x46a   :  { %3897 = vtanh.f32 %v2824_v34  ;;  %v2826_v41 = vadd.f32 %v2825_v33, %v2785_v35 }
 0x46b   :  { %v2787_v42 = vpop.f32.mrf.mxu0  ;;  %v2828_v43 = vpop.f32.mrf.mxu1 }
 0x46c   :  { %3899 = vtanh.f32 %v2826_v41 }
 0x477   :  { %v3898_v45 = vpop.eup %3897 }
 0x478   :  { %3001 = vst [vmem:[#allocation17 + $0x10] sm:$0xff] %v3898_v45 }
 0x479   :  { %v3900_v60 = vpop.eup %3899 }
 0x47a   :  { %3002 = vst [vmem:[#allocation17 + $0x18] sm:$0xff] %v3900_v60 }
 0x4a5   :  { %v2864_v50 = vpop.f32.mrf.mxu0 }
 0x4a6   :  { %v2865_v51 = vadd.f32 %v2864_v50, %v1498_v47  ;;  %v2905_v52 = vpop.f32.mrf.mxu1 }
 0x4a7   :  { %v2866_v53 = vpop.f32.mrf.mxu0 }
 0x4a8   :  { %v2906_v54 = vadd.f32 %v2905_v52, %v2865_v51  ;;  %v2867_v55 = vadd.f32 %v2866_v53, %v1502_v49  ;;  %v2907_v56 = vpop.f32.mrf.mxu1 }
 0x4a9   :  { %v2868_v57 = vpop.f32.mrf.mxu0 }
 0x4aa   :  { %3901 = vtanh.f32 %v2906_v54  ;;  %v2908_v58 = vadd.f32 %v2907_v56, %v2867_v55  ;;  %v2909_v20 = vpop.f32.mrf.mxu1 }
 0x4ab   :  { %v2869_v48 = vpop.f32.mrf.mxu0 }
 0x4ac   :  { %3903 = vtanh.f32 %v2908_v58  ;;  %v2910_v44 = vpop.f32.mrf.mxu1 }
 0x4b7   :  { %v3902_v5 = vpop.eup %3901 }
 0x4b8   :  { %3003 = vst [vmem:[#allocation17 + $0x20] sm:$0xff] %v3902_v5 }
 0x4b9   :  { %v3904_v59 = vpop.eup %3903 }
 0x4ba   :  { %3004 = vst [vmem:[#allocation17 + $0x28] sm:$0xff] %v3904_v59 }
 0x4c5   :  { %v3363_v63 = vpop.f32.mrf.mxu0 }
 0x4c6   :  { %v3385_v0 = vpop.f32.mrf.mxu1 }
 0x4c7   :  { %v3364_v4 = vpop.f32.mrf.mxu0 }
 0x4c8   :  { %v3365_v7 = vadd.f32 %v3364_v4, %v3363_v63  ;;  %v3386_v8 = vpop.f32.mrf.mxu1 }
 0x4c9   :  { %v3366_v3 = vpop.f32.mrf.mxu0  ;;  %v3387_v9 = vadd.f32 %v3386_v8, %v3385_v0 }
 0x4ca   :  { %v2947_v1 = vadd.f32 %v3365_v7, %v1506_v2  ;;  %v3388_v10 = vpop.f32.mrf.mxu1 }
 0x4cb   :  { %v3367_v11 = vpop.f32.mrf.mxu0 }
 0x4cc   :  { %v2987_v15 = vadd.f32 %v3387_v9, %v2947_v1  ;;  %v3389_v16 = vpop.f32.mrf.mxu1 }
 0x4ce   :  { %3905 = vtanh.f32 %v2987_v15 }
 0x4db   :  { %v3906_v25 = vpop.eup %3905 }
 0x4dc   :  { %3005 = vst [vmem:[#allocation17 + $0x30] sm:$0xff] %v3906_v25 }
 0x4dd   :  { %4098 = shalt.err (!%p4095_p7)
}
 0x4de   :  { %3015 = dma.vmem_to_hbm [thread:$0]  %s3013_s19, 896, %s4386_s13, [#allocation4]  }
 0x4df   :  { %4117 = dma.done.wait [#allocation4], 896  }
 0x4e0   :  { %4118 = vsyncadd [#allocation4], 4294966400 }
 0x4e1   :  { %3019 = vsyncpa [#allocation3], 1 }
 0x4e2   :  { %3020 = vsyncpa [#allocation6], 1 }
 0x4e3   :  { %3021 = vsyncpa [#allocation9], 1 }
 0x4e4   :  { %3022 = vsyncpa [#allocation12], 1 }
 0x4e5   :  { %3023 = vsyncpa [#allocation15], 1 }
 0x4e6   :  { %3024 = vsyncpa [#allocation4], 1 }

</bundles_post_ra>
